<compile_context>
chip_gen: v6e
topology: v6e:2x2x1
jax: 0.10.0
libtpu: 0.0.40
codegen_flags: <defaults>
</compile_context>

<pallas_src>
import functools

import jax
import jax.numpy as jnp
from jax.experimental import pallas as pl
from jax.experimental.pallas import tpu as pltpu

IN_DIM = 3       # (x, y, nu)
HID_PAD = 128    # padded hidden width (lane dim)
OUT_DIM = 3      # (u, v, p)
BIAS_LANE = 20   # hidden lane used as bias carrier for layers 2-4 (value = sigmoid(0) = 0.5)
MAX_TILE_B = 2048  # rows/grid-step cap (keeps live activations tiny vs scoped VMEM on all gens)


def _sigmoid(x):
    # Exact sigmoid via a single EUP tanh (keeps VALU slots free).
    return 0.5 * (jnp.tanh(0.5 * x) + 1.0)


def _mlp_kernel(x_ref, w1_ref, b1_ref, w_ref, o_ref):
    # x_ref: (TILE_B, 3); w1_ref: (3, 128); b1_ref: (1, 128);
    # w_ref: (3, 128, 128); o_ref: (TILE_B, 3)
    x = x_ref[...]
    h = _sigmoid(jnp.dot(x, w1_ref[...], preferred_element_type=jnp.float32) + b1_ref[...])
    h = _sigmoid(jnp.dot(h, w_ref[0], preferred_element_type=jnp.float32))
    h = _sigmoid(jnp.dot(h, w_ref[1], preferred_element_type=jnp.float32))
    out = jnp.dot(h, w_ref[2], preferred_element_type=jnp.float32)
    o_ref[...] = out[:, :OUT_DIM].astype(o_ref.dtype)


def pack_params(params):
    """One-time weight preparation (call once, outside the jitted forward).

    PyTorch layout: weight is (out_features, in_features); the kernel computes x @ W.
    fc1 bias stays explicit (broadcast-add in kernel); fc2-4 biases are folded into
    wstack row BIAS_LANE as 2*b (see module docstring; rows 21..127 MUST stay zero)."""
    f32 = jnp.float32

    w1 = jnp.zeros((IN_DIM, HID_PAD), f32).at[:, :20].set(params["fc1_w"].T.astype(f32))
    b1 = jnp.zeros((1, HID_PAD), f32).at[0, :20].set(params["fc1_b"].astype(f32))

    wstack = jnp.zeros((3, HID_PAD, HID_PAD), f32)
    for l, (wk, bk, n_out) in enumerate(
            [("fc2_w", "fc2_b", 20), ("fc3_w", "fc3_b", 20), ("fc4_w", "fc4_b", OUT_DIM)]):
        wstack = wstack.at[l, :20, :n_out].set(params[wk].T.astype(f32))
        wstack = wstack.at[l, BIAS_LANE, :n_out].set(2.0 * params[bk].astype(f32))
    return w1, b1, wstack


@functools.lru_cache(maxsize=1)
def _num_tensorcores():
    """TensorCores behind one Pallas device. v5e/v6e: 1; v4 megacore / v7x: 2."""
    try:
        kind = jax.devices()[0].device_kind.lower()
    except Exception:
        return 1
    return 2 if ("v7" in kind or "v4" in kind) else 1


def _choose_num_tiles(B, num_tc):
    """Split the batch only when there are 2 TCs to feed, and never below 128 rows/tile.
    Grow the grid (instead of the tile) past MAX_TILE_B rows for VMEM headroom."""
    def splits_ok(n):
        t = B // n
        return n > 0 and B % n == 0 and t % 8 == 0 and t >= 128

    n = num_tc if (num_tc > 1 and splits_ok(num_tc)) else 1
    while B // n > MAX_TILE_B and splits_ok(2 * n):
        n *= 2
    return n


@functools.partial(jax.jit, static_argnames=("num_tiles",))
def _forward_impl(X, w1, b1, wstack, *, num_tiles):
    B = X.shape[0]
    tile_b = B // num_tiles
    return pl.pallas_call(
        _mlp_kernel,
        out_shape=jax.ShapeDtypeStruct((B, OUT_DIM), jnp.float32),
        grid=(num_tiles,),
        in_specs=[
            pl.BlockSpec((tile_b, IN_DIM), lambda i: (i, 0)),
            pl.BlockSpec((IN_DIM, HID_PAD), lambda i: (0, 0)),
            pl.BlockSpec((1, HID_PAD), lambda i: (0, 0)),
            pl.BlockSpec((3, HID_PAD, HID_PAD), lambda i: (0, 0, 0)),
        ],
        out_specs=pl.BlockSpec((tile_b, OUT_DIM), lambda i: (i, 0)),
        compiler_params=pltpu.CompilerParams(dimension_semantics=("parallel",)),
    )(X, w1, b1, wstack)


def circle_pipe_pinn_forward(X, packed):
    """X: (B, 3) float32 (x, y, nu).  packed: output of pack_params.  Returns (B, 3)."""
    w1, b1, wstack = packed
    num_tiles = _choose_num_tiles(X.shape[0], _num_tensorcores())
    return _forward_impl(X.astype(jnp.float32), w1, b1, wstack, num_tiles=num_tiles)


def init_params(key):
    """Deterministic init matching nn.Linear default: U(-1/sqrt(fan_in), +1/sqrt(fan_in))."""
    dims = [(3, 20), (20, 20), (20, 20), (20, 3)]
    params = {}
    for idx, (fan_in, fan_out) in enumerate(dims, start=1):
        key, kw, kb = jax.random.split(key, 3)
        bound = 1.0 / jnp.sqrt(fan_in)
        params[f"fc{idx}_w"] = jax.random.uniform(
            kw, (fan_out, fan_in), jnp.float32, -bound, bound)
        params[f"fc{idx}_b"] = jax.random.uniform(
            kb, (fan_out,), jnp.float32, -bound, bound)
    return params


def _reference_forward(X, params):
    hp = jax.lax.Precision.HIGHEST
    h = jax.nn.sigmoid(jnp.dot(X, params["fc1_w"].T, precision=hp) + params["fc1_b"])
    h = jax.nn.sigmoid(jnp.dot(h, params["fc2_w"].T, precision=hp) + params["fc2_b"])
    h = jax.nn.sigmoid(jnp.dot(h, params["fc3_w"].T, precision=hp) + params["fc3_b"])
    return jnp.dot(h, params["fc4_w"].T, precision=hp) + params["fc4_b"]


# TODO(synk): pdeLoss / bcLoss / train / plotOutputSpace (autograd PDE residuals,
# Adam loop, matplotlib) are training/plot utilities, not part of the forward pass.

if __name__ == "__main__":
    key = jax.random.PRNGKey(0)
    key, kx = jax.random.split(key)

    params = init_params(key)
    packed = pack_params(params)          # one-time prep, outside the jitted forward

    # Batch consistent with the module's BATCH_SIZE and (N, 3) input of (x, y, nu).
    B = 256
    X = jax.random.uniform(kx, (B, 3), jnp.float32)
    X = X.at[:, 0].multiply(1.0)              # LENGTH
    X = X.at[:, 1].set(X[:, 1] * 0.1 - 0.05)  # DIAMETER scaling
    X = X.at[:, 2].multiply(0.002)            # MAX_NU

    out = jax.block_until_ready(circle_pipe_pinn_forward(X, packed))

    ref = _reference_forward(X, params)
    assert out.shape == (B, OUT_DIM)
    max_diff = float(jnp.max(jnp.abs(out - ref)))
    assert jnp.allclose(out, ref, atol=1e-4, rtol=1e-4), f"mismatch vs reference: {max_diff}"

    print("KERNEL_OK")
</pallas_src>

<mosaic_0001>
module attributes {stable_mosaic.version = 11 : i64} {
  func.func @_mlp_kernel(%arg0: i32, %arg1: memref<256x3xf32, #tpu.memory_space<vmem>>, %arg2: memref<3x128xf32, #tpu.memory_space<vmem>>, %arg3: memref<1x128xf32, #tpu.memory_space<vmem>>, %arg4: memref<3x128x128xf32, #tpu.memory_space<vmem>>, %arg5: memref<256x3xf32, #tpu.memory_space<vmem>>) attributes {dimension_semantics = [#tpu.dimension_semantics<parallel>], iteration_bounds = array<i64: 1>, scalar_prefetch = 0 : i64, scratch_operands = 0 : i64, tpu.core_type = #tpu.core_type<tc>, window_params = [{transform_indices = @transform_0, window_bounds = array<i64: 256, 3>}, {pipeline_mode = #tpu.pipeline_mode<synchronous>, transform_indices = @transform_1, window_bounds = array<i64: 3, 128>}, {pipeline_mode = #tpu.pipeline_mode<synchronous>, transform_indices = @transform_2, window_bounds = array<i64: 1, 128>}, {pipeline_mode = #tpu.pipeline_mode<synchronous>, transform_indices = @transform_3, window_bounds = array<i64: 3, 128, 128>}, {transform_indices = @transform_4, window_bounds = array<i64: 256, 3>}]} {
    %c0 = arith.constant 0 : index
    %c0_0 = arith.constant 0 : index
    %0 = vector.load %arg1[%c0, %c0_0] : memref<256x3xf32, #tpu.memory_space<vmem>>, vector<256x3xf32>
    %c0_1 = arith.constant 0 : index
    %c0_2 = arith.constant 0 : index
    %1 = vector.load %arg2[%c0_1, %c0_2] : memref<3x128xf32, #tpu.memory_space<vmem>>, vector<3x128xf32>
    %cst = arith.constant dense<0.000000e+00> : vector<256x128xf32>
    %2 = tpu.matmul %0, %1, %cst {dimension_numbers = #tpu.dot_dimension_numbers<[1], [0], [0], [1], [0, 0, 1, 1], [], []>} : vector<256x3xf32>, vector<3x128xf32>, vector<256x128xf32> -> vector<256x128xf32>
    %c0_3 = arith.constant 0 : index
    %c0_4 = arith.constant 0 : index
    %3 = vector.load %arg3[%c0_3, %c0_4] : memref<1x128xf32, #tpu.memory_space<vmem>>, vector<1x128xf32>
    %4 = vector.broadcast %3 : vector<1x128xf32> to vector<256x128xf32>
    %5 = arith.addf %2, %4 : vector<256x128xf32>
    %cst_5 = arith.constant 5.000000e-01 : f32
    %6 = vector.broadcast %cst_5 : f32 to vector<256x128xf32>
    %7 = arith.mulf %6, %5 : vector<256x128xf32>
    %8 = math.tanh %7 : vector<256x128xf32>
    %cst_6 = arith.constant 1.000000e+00 : f32
    %9 = vector.broadcast %cst_6 : f32 to vector<256x128xf32>
    %10 = arith.addf %8, %9 : vector<256x128xf32>
    %cst_7 = arith.constant 5.000000e-01 : f32
    %11 = vector.broadcast %cst_7 : f32 to vector<256x128xf32>
    %12 = arith.mulf %11, %10 : vector<256x128xf32>
    %c0_8 = arith.constant 0 : index
    %c0_9 = arith.constant 0 : index
    %c0_10 = arith.constant 0 : index
    %13 = vector.load %arg4[%c0_8, %c0_9, %c0_10] : memref<3x128x128xf32, #tpu.memory_space<vmem>>, vector<1x128x128xf32>
    %14 = vector.shape_cast %13 : vector<1x128x128xf32> to vector<128x128xf32>
    %cst_11 = arith.constant dense<0.000000e+00> : vector<256x128xf32>
    %15 = tpu.matmul %12, %14, %cst_11 {dimension_numbers = #tpu.dot_dimension_numbers<[1], [0], [0], [1], [0, 0, 1, 1], [], []>} : vector<256x128xf32>, vector<128x128xf32>, vector<256x128xf32> -> vector<256x128xf32>
    %cst_12 = arith.constant 5.000000e-01 : f32
    %16 = vector.broadcast %cst_12 : f32 to vector<256x128xf32>
    %17 = arith.mulf %16, %15 : vector<256x128xf32>
    %18 = math.tanh %17 : vector<256x128xf32>
    %cst_13 = arith.constant 1.000000e+00 : f32
    %19 = vector.broadcast %cst_13 : f32 to vector<256x128xf32>
    %20 = arith.addf %18, %19 : vector<256x128xf32>
    %cst_14 = arith.constant 5.000000e-01 : f32
    %21 = vector.broadcast %cst_14 : f32 to vector<256x128xf32>
    %22 = arith.mulf %21, %20 : vector<256x128xf32>
    %c1 = arith.constant 1 : index
    %c0_15 = arith.constant 0 : index
    %c0_16 = arith.constant 0 : index
    %23 = vector.load %arg4[%c1, %c0_15, %c0_16] : memref<3x128x128xf32, #tpu.memory_space<vmem>>, vector<1x128x128xf32>
    %24 = vector.shape_cast %23 : vector<1x128x128xf32> to vector<128x128xf32>
    %cst_17 = arith.constant dense<0.000000e+00> : vector<256x128xf32>
    %25 = tpu.matmul %22, %24, %cst_17 {dimension_numbers = #tpu.dot_dimension_numbers<[1], [0], [0], [1], [0, 0, 1, 1], [], []>} : vector<256x128xf32>, vector<128x128xf32>, vector<256x128xf32> -> vector<256x128xf32>
    %cst_18 = arith.constant 5.000000e-01 : f32
    %26 = vector.broadcast %cst_18 : f32 to vector<256x128xf32>
    %27 = arith.mulf %26, %25 : vector<256x128xf32>
    %28 = math.tanh %27 : vector<256x128xf32>
    %cst_19 = arith.constant 1.000000e+00 : f32
    %29 = vector.broadcast %cst_19 : f32 to vector<256x128xf32>
    %30 = arith.addf %28, %29 : vector<256x128xf32>
    %cst_20 = arith.constant 5.000000e-01 : f32
    %31 = vector.broadcast %cst_20 : f32 to vector<256x128xf32>
    %32 = arith.mulf %31, %30 : vector<256x128xf32>
    %c2 = arith.constant 2 : index
    %c0_21 = arith.constant 0 : index
    %c0_22 = arith.constant 0 : index
    %33 = vector.load %arg4[%c2, %c0_21, %c0_22] : memref<3x128x128xf32, #tpu.memory_space<vmem>>, vector<1x128x128xf32>
    %34 = vector.shape_cast %33 : vector<1x128x128xf32> to vector<128x128xf32>
    %cst_23 = arith.constant dense<0.000000e+00> : vector<256x128xf32>
    %35 = tpu.matmul %32, %34, %cst_23 {dimension_numbers = #tpu.dot_dimension_numbers<[1], [0], [0], [1], [0, 0, 1, 1], [], []>} : vector<256x128xf32>, vector<128x128xf32>, vector<256x128xf32> -> vector<256x128xf32>
    %36 = vector.extract_strided_slice %35 {offsets = [0, 0], sizes = [256, 3], strides = [1, 1]} : vector<256x128xf32> to vector<256x3xf32>
    %c0_24 = arith.constant 0 : index
    %c0_25 = arith.constant 0 : index
    %37 = vector.load %arg5[%c0_24, %c0_25] : memref<256x3xf32, #tpu.memory_space<vmem>>, vector<256x3xf32>
    tpu.vector_store %arg5[%c0_24, %c0_25], %36 {strides = array<i32>} : memref<256x3xf32, #tpu.memory_space<vmem>>, vector<256x3xf32>,
    return
  }
  func.func @transform_0(%arg0: i32) -> (i32, i32) {
    %c0_i32 = arith.constant 0 : i32
    %c0_i32_0 = arith.constant 0 : i32
    return %arg0, %c0_i32 : i32, i32
  }
  func.func @transform_1(%arg0: i32) -> (i32, i32) {
    %c0_i32 = arith.constant 0 : i32
    %c0_i32_0 = arith.constant 0 : i32
    %c0_i32_1 = arith.constant 0 : i32
    return %c0_i32, %c0_i32_0 : i32, i32
  }
  func.func @transform_2(%arg0: i32) -> (i32, i32) {
    %c0_i32 = arith.constant 0 : i32
    %c0_i32_0 = arith.constant 0 : i32
    %c0_i32_1 = arith.constant 0 : i32
    return %c0_i32, %c0_i32_0 : i32, i32
  }
  func.func @transform_3(%arg0: i32) -> (i32, i32, i32) {
    %c0_i32 = arith.constant 0 : i32
    %c0_i32_0 = arith.constant 0 : i32
    %c0_i32_1 = arith.constant 0 : i32
    %c0_i32_2 = arith.constant 0 : i32
    return %c0_i32, %c0_i32_0, %c0_i32_1 : i32, i32, i32
  }
  func.func @transform_4(%arg0: i32) -> (i32, i32) {
    %c0_i32 = arith.constant 0 : i32
    %c0_i32_0 = arith.constant 0 : i32
    return %arg0, %c0_i32 : i32, i32
  }
}

</mosaic_0001>

<bundles_post_ra>
// kernel: _forward_impl.1
= control target key start
LH: loop header
LB: loop body
LE: loop exit
PB: predicated region body
PF: predicated region fallthrough
CT: control target
= control target key end

     0   :  { %9 = vsyncpa [#allocation3], 0  ;;  %s2293_s15 = smov [#allocation2]   ;;  %s2668_s0 = inlined_call_operand.vmem [shape: f32[256,3], index: 0, kind: input, shape index: {}]   ;;  %s2669_s1 = inlined_call_operand.vmem [shape: f32[3,128], index: 1, kind: input, shape index: {}]   ;;  %s2670_s2 = inlined_call_operand.vmem [shape: f32[1,128], index: 2, kind: input, shape index: {}]   ;;  %s2671_s3 = inlined_call_operand.hbm [shape: f32[3,128,128], index: 3, kind: input, shape index: {}]   ;;  %s2672_s4 = inlined_call_operand.vmem [shape: f32[256,3], index: 4, kind: output, shape index: {}]  }
   0x1   :  { %s21_s16 = sshll.u32 %s2293_s15, 4  ;;  %s22_s16 = int_to_ptr.vmem [resolvable:$true] %s21_s16 }
   0x2   :  { %s2279_s17 = scalar_lea.vmem %s22_s16, 6144  ;;  %p2284_p1 = scmp.lt.s32.totalorder %s22_s16, %s22_s16 }
   0x3   :  { %p2280_p0 = scmp.ne.s32.totalorder %s22_s16, %s2279_s17  ;;  %p2285_p2 = scmp.lt.s32.totalorder %s2279_s17, %s2279_s17 }
   0x5   :  { %p2286_p3 = por %p2285_p2, %p2284_p1 }
   0x7   :  { %p2287_p4 = pnand %p2286_p3, %p2280_p0 }
   0x9   :  { %2290 = shalt.err (!%p2287_p4)
}
   0xa   :  { %s2294_s18 = smov 128   ;;  %s2295_s19 = smov 8  }
   0xb   :  { %27 = dma.hbm_to_vmem [thread:$0]  %s2671_s3, 6144, %s22_s16, [#allocation3], %s2294_s18, %s2294_s18, %s2295_s19  }
   0xc   :  { %2291 = dma.done.wait [#allocation3], 6144  }
   0xd   :  { %2292 = vsyncadd [#allocation3], 4294961152  ;;  %vm168_vm0 = vcmask 1042432   ;;  %vm71_vm1 = vcmask 23552   ;;  %v63_v0 = vld [vmem:[%s2669_s1] sm:$0x7] }
   0xe   :  { %v31_v1 = vld [vmem:[%s2668_s0] sm:$0xff]  ;;  %v32_v2 = vld [vmem:[%s2668_s0 + $0x8] sm:$0xff]  ;;  %1754 = vmatprep.subr.msk.mxu0 %vm168_vm0, %v63_v0  ;;  %v33_v3 = vld [vmem:[%s2668_s0 + $0x10] sm:$0xff] }
   0xf   :  { %1756 = vmatprep.mubr.msk.f32.mxu0 %vm71_vm1, %v31_v1  ;;  %1755 = vmatpush3.msk.msra.mxu0 %vm168_vm0, %v63_v0  ;;  %v34_v4 = vld [vmem:[%s2668_s0 + $0x18] sm:$0xff]  ;;  %v35_v5 = vld [vmem:[%s2668_s0 + $0x20] sm:$0xff]  ;;  %v36_v6 = vld [vmem:[%s2668_s0 + $0x28] sm:$0xff] }
  0x10   :  { %1757 = vmatmul.mubr.msk.f32.vlgmr.msra.gmra.mxu0 %vm71_vm1, %v32_v2  ;;  %v37_v7 = vld [vmem:[%s2668_s0 + $0x30] sm:$0xff]  ;;  %v540_v8 = vld [vmem:[#allocation2 + $0x78] sm:$0xff]  ;;  %v39_v11 = vld [vmem:[%s2668_s0 + $0x40] sm:$0xff] }
  0x11   :  { %1759 = vmatprep.mubr.msk.f32.mxu0 %vm71_vm1, %v33_v3  ;;  %v539_v9 = vld [vmem:[#allocation2 + $0x70] sm:$0xff]  ;;  %v38_v10 = vld [vmem:[%s2668_s0 + $0x38] sm:$0xff]  ;;  %1804 = vmatprep.subr.mxu1 %v540_v8  ;;  %v538_v12 = vld [vmem:[#allocation2 + $0x68] sm:$0xff] }
  0x12   :  { %1805 = vmatpush3.msra.mxu1 %v540_v8  ;;  %v40_v13 = vld [vmem:[%s2668_s0 + $0x48] sm:$0xff]  ;;  %v41_v14 = vld [vmem:[%s2668_s0 + $0x50] sm:$0xff]  ;;  %v42_v15 = vld [vmem:[%s2668_s0 + $0x58] sm:$0xff] }
  0x13   :  { %1806 = vmatprep.subr.mxu1 %v539_v9  ;;  %v43_v16 = vld [vmem:[%s2668_s0 + $0x60] sm:$0xff]  ;;  %v44_v17 = vld [vmem:[%s2668_s0 + $0x68] sm:$0xff]  ;;  %v45_v18 = vld [vmem:[%s2668_s0 + $0x70] sm:$0xff] }
  0x14   :  { %1760 = vmatmul.mubr.msk.f32.gmra.mxu0 %vm71_vm1, %v34_v4  ;;  %1807 = vmatpush3.msra.mxu1 %v539_v9  ;;  %v46_v19 = vld [vmem:[%s2668_s0 + $0x78] sm:$0xff]  ;;  %v47_v20 = vld [vmem:[%s2668_s0 + $0x80] sm:$0xff]  ;;  %v48_v21 = vld [vmem:[%s2668_s0 + $0x88] sm:$0xff] }
  0x15   :  { %1762 = vmatprep.mubr.msk.f32.mxu0 %vm71_vm1, %v35_v5  ;;  %1808 = vmatprep.subr.mxu1 %v538_v12  ;;  %v49_v22 = vld [vmem:[%s2668_s0 + $0x90] sm:$0xff]  ;;  %v50_v23 = vld [vmem:[%s2668_s0 + $0x98] sm:$0xff]  ;;  %v51_v24 = vld [vmem:[%s2668_s0 + $0xa0] sm:$0xff] }
  0x16   :  { %1809 = vmatpush3.msra.mxu1 %v538_v12  ;;  %v52_v25 = vld [vmem:[%s2668_s0 + $0xa8] sm:$0xff]  ;;  %v53_v26 = vld [vmem:[%s2668_s0 + $0xb0] sm:$0xff]  ;;  %v54_v27 = vld [vmem:[%s2668_s0 + $0xb8] sm:$0xff] }
  0x17   :  { %v55_v28 = vld [vmem:[%s2668_s0 + $0xc0] sm:$0xff]  ;;  %v56_v29 = vld [vmem:[%s2668_s0 + $0xc8] sm:$0xff]  ;;  %v57_v30 = vld [vmem:[%s2668_s0 + $0xd0] sm:$0xff] }
  0x18   :  { %1763 = vmatmul.mubr.msk.f32.gmra.mxu0 %vm71_vm1, %v36_v6  ;;  %v58_v31 = vld [vmem:[%s2668_s0 + $0xd8] sm:$0xff]  ;;  %v59_v32 = vld [vmem:[%s2668_s0 + $0xe0] sm:$0xff]  ;;  %v60_v33 = vld [vmem:[%s2668_s0 + $0xe8] sm:$0xff] }
  0x19   :  { %1765 = vmatprep.mubr.msk.f32.mxu0 %vm71_vm1, %v37_v7  ;;  %v61_v34 = vld [vmem:[%s2668_s0 + $0xf0] sm:$0xff]  ;;  %v62_v35 = vld [vmem:[%s2668_s0 + $0xf8] sm:$0xff]  ;;  %v537_v36 = vld [vmem:[#allocation2 + $0x60] sm:$0xff] }
  0x1a   :  { %1810 = vmatprep.subr.mxu1 %v537_v36  ;;  %v536_v37 = vld [vmem:[#allocation2 + $0x58] sm:$0xff]  ;;  %v535_v38 = vld [vmem:[#allocation2 + $0x50] sm:$0xff]  ;;  %v534_v39 = vld [vmem:[#allocation2 + $0x48] sm:$0xff] }
  0x1b   :  { %1811 = vmatpush3.msra.mxu1 %v537_v36  ;;  %v533_v40 = vld [vmem:[#allocation2 + $0x40] sm:$0xff]  ;;  %v532_v41 = vld [vmem:[#allocation2 + $0x38] sm:$0xff]  ;;  %v531_v42 = vld [vmem:[#allocation2 + $0x30] sm:$0xff] }
  0x1c   :  { %1766 = vmatmul.mubr.msk.f32.gmra.mxu0 %vm71_vm1, %v38_v10  ;;  %1812 = vmatprep.subr.mxu1 %v536_v37  ;;  %v530_v43 = vld [vmem:[#allocation2 + $0x28] sm:$0xff]  ;;  %v529_v44 = vld [vmem:[#allocation2 + $0x20] sm:$0xff]  ;;  %v528_v45 = vld [vmem:[#allocation2 + $0x18] sm:$0xff] }
  0x1d   :  { %1768 = vmatprep.mubr.msk.f32.mxu0 %vm71_vm1, %v39_v11  ;;  %1813 = vmatpush3.msra.mxu1 %v536_v37  ;;  %v527_v46 = vld [vmem:[#allocation2 + $0x10] sm:$0xff]  ;;  %v526_v47 = vld [vmem:[#allocation2 + $0x8] sm:$0xff]  ;;  %v525_v48 = vld [vmem:[#allocation2] sm:$0xff] }
  0x1e   :  { %1814 = vmatprep.subr.mxu1 %v535_v38  ;;  %v910_v49 = vld [vmem:[#allocation2 + $0xf8] sm:$0xff]  ;;  %v909_v50 = vld [vmem:[#allocation2 + $0xf0] sm:$0xff]  ;;  %v908_v51 = vld [vmem:[#allocation2 + $0xe8] sm:$0xff] }
  0x1f   :  { %1815 = vmatpush3.msra.mxu1 %v535_v38  ;;  %1884 = vmatprep.subr.mxu0 %v910_v49  ;;  %v907_v52 = vld [vmem:[#allocation2 + $0xe0] sm:$0xff]  ;;  %v906_v53 = vld [vmem:[#allocation2 + $0xd8] sm:$0xff]  ;;  %v905_v54 = vld [vmem:[#allocation2 + $0xd0] sm:$0xff] }
  0x20   :  { %1769 = vmatmul.mubr.msk.f32.gmra.mxu0 %vm71_vm1, %v40_v13  ;;  %1816 = vmatprep.subr.mxu1 %v534_v39  ;;  %v904_v55 = vld [vmem:[#allocation2 + $0xc8] sm:$0xff]  ;;  %v903_v56 = vld [vmem:[#allocation2 + $0xc0] sm:$0xff]  ;;  %v902_v57 = vld [vmem:[#allocation2 + $0xb8] sm:$0xff] }
  0x21   :  { %1771 = vmatprep.mubr.msk.f32.mxu0 %vm71_vm1, %v41_v14  ;;  %1817 = vmatpush3.msra.mxu1 %v534_v39  ;;  %v901_v58 = vld [vmem:[#allocation2 + $0xb0] sm:$0xff]  ;;  %v900_v59 = vld [vmem:[#allocation2 + $0xa8] sm:$0xff]  ;;  %v2458_v60 = vld [vmem:[%s2670_s2] ss:$0 sm:$0xff] }
  0x22   :  { %1818 = vmatprep.subr.mxu1 %v533_v40  ;;  %1885 = vmatpush3.msra.mxu0 %v910_v49 }
  0x23   :  { %1819 = vmatpush3.msra.mxu1 %v533_v40  ;;  %1886 = vmatprep.subr.mxu0 %v909_v50 }
  0x24   :  { %1772 = vmatmul.mubr.msk.f32.gmra.mxu0 %vm71_vm1, %v42_v15  ;;  %1820 = vmatprep.subr.mxu1 %v532_v41 }
  0x25   :  { %1774 = vmatprep.mubr.msk.f32.mxu0 %vm71_vm1, %v43_v16  ;;  %1821 = vmatpush3.msra.mxu1 %v532_v41 }
  0x26   :  { %1822 = vmatprep.subr.mxu1 %v531_v42  ;;  %1887 = vmatpush3.msra.mxu0 %v909_v50 }
  0x27   :  { %1823 = vmatpush3.msra.mxu1 %v531_v42  ;;  %1888 = vmatprep.subr.mxu0 %v908_v51 }
  0x28   :  { %1775 = vmatmul.mubr.msk.f32.gmra.mxu0 %vm71_vm1, %v44_v17  ;;  %1824 = vmatprep.subr.mxu1 %v530_v43 }
  0x29   :  { %1777 = vmatprep.mubr.msk.f32.mxu0 %vm71_vm1, %v45_v18  ;;  %1825 = vmatpush3.msra.mxu1 %v530_v43 }
  0x2a   :  { %1826 = vmatprep.subr.mxu1 %v529_v44  ;;  %1889 = vmatpush3.msra.mxu0 %v908_v51 }
  0x2b   :  { %1827 = vmatpush3.msra.mxu1 %v529_v44  ;;  %1890 = vmatprep.subr.mxu0 %v907_v52 }
  0x2c   :  { %1778 = vmatmul.mubr.msk.f32.gmra.mxu0 %vm71_vm1, %v46_v19  ;;  %1828 = vmatprep.subr.mxu1 %v528_v45 }
  0x2d   :  { %1780 = vmatprep.mubr.msk.f32.mxu0 %vm71_vm1, %v47_v20  ;;  %1829 = vmatpush3.msra.mxu1 %v528_v45 }
  0x2e   :  { %1830 = vmatprep.subr.mxu1 %v527_v46  ;;  %1891 = vmatpush3.msra.mxu0 %v907_v52 }
  0x2f   :  { %1831 = vmatpush3.msra.mxu1 %v527_v46  ;;  %1892 = vmatprep.subr.mxu0 %v906_v53 }
  0x30   :  { %1781 = vmatmul.mubr.msk.f32.gmra.mxu0 %vm71_vm1, %v48_v21  ;;  %1832 = vmatprep.subr.mxu1 %v526_v47 }
  0x31   :  { %1783 = vmatprep.mubr.msk.f32.mxu0 %vm71_vm1, %v49_v22  ;;  %1833 = vmatpush3.msra.mxu1 %v526_v47 }
  0x32   :  { %1834 = vmatprep.subr.mxu1 %v525_v48  ;;  %1893 = vmatpush3.msra.mxu0 %v906_v53 }
  0x33   :  { %1835 = vmatpush3.msra.mxu1 %v525_v48  ;;  %1894 = vmatprep.subr.mxu0 %v905_v54 }
  0x34   :  { %1784 = vmatmul.mubr.msk.f32.gmra.mxu0 %vm71_vm1, %v50_v23 }
  0x35   :  { %1786 = vmatprep.mubr.msk.f32.mxu0 %vm71_vm1, %v51_v24  ;;  %1895 = vmatpush3.msra.mxu0 %v905_v54 }
  0x36   :  { %1896 = vmatprep.subr.mxu0 %v904_v55 }
  0x37   :  { %1897 = vmatpush3.msra.mxu0 %v904_v55 }
  0x38   :  { %1787 = vmatmul.mubr.msk.f32.gmra.mxu0 %vm71_vm1, %v52_v25  ;;  %1898 = vmatprep.subr.mxu0 %v903_v56 }
  0x39   :  { %1789 = vmatprep.mubr.msk.f32.mxu0 %vm71_vm1, %v53_v26  ;;  %1899 = vmatpush3.msra.mxu0 %v903_v56 }
  0x3a   :  { %1900 = vmatprep.subr.mxu0 %v902_v57 }
  0x3b   :  { %1901 = vmatpush3.msra.mxu0 %v902_v57 }
  0x3c   :  { %1790 = vmatmul.mubr.msk.f32.gmra.mxu0 %vm71_vm1, %v54_v27  ;;  %1902 = vmatprep.subr.mxu0 %v901_v58 }
  0x3d   :  { %1792 = vmatprep.mubr.msk.f32.mxu0 %vm71_vm1, %v55_v28  ;;  %1903 = vmatpush3.msra.mxu0 %v901_v58 }
  0x3e   :  { %1904 = vmatprep.subr.mxu0 %v900_v59 }
  0x3f   :  { %1905 = vmatpush3.msra.mxu0 %v900_v59 }
  0x40   :  { %1793 = vmatmul.mubr.msk.f32.gmra.mxu0 %vm71_vm1, %v56_v29 }
  0x41   :  { %1795 = vmatprep.mubr.msk.f32.mxu0 %vm71_vm1, %v57_v30 }
  0x44   :  { %1796 = vmatmul.mubr.msk.f32.gmra.mxu0 %vm71_vm1, %v58_v31 }
  0x45   :  { %1798 = vmatprep.mubr.msk.f32.mxu0 %vm71_vm1, %v59_v32 }
  0x48   :  { %1799 = vmatmul.mubr.msk.f32.gmra.mxu0 %vm71_vm1, %v60_v33 }
  0x49   :  { %1801 = vmatprep.mubr.msk.f32.mxu0 %vm71_vm1, %v61_v34 }
  0x4c   :  { %1802 = vmatmul.mubr.msk.f32.gmra.mxu0 %vm71_vm1, %v62_v35 }
  0xd0   :  { %v1758_v61 = vpop.f32.mrf.mxu0 }
  0xd1   :  { %v244_v62 = vadd.f32 %v1758_v61, %v2458_v60 }
  0xd2   :  { %v238_v63 = vpop.f32.mrf.mxu0 }
  0xd3   :  { %v398_v0 = vmul.f32 0.5, %v244_v62  ;;  %v239_v1 = vadd.f32 %v2458_v60, %v238_v63 }
  0xd4   :  { %v1761_v2 = vpop.f32.mrf.mxu0 }
  0xd5   :  { %2079 = vtanh.f32 %v398_v0  ;;  %v397_v3 = vmul.f32 0.5, %v239_v1  ;;  %v254_v4 = vadd.f32 %v1761_v2, %v2458_v60 }
  0xd6   :  { %v248_v5 = vpop.f32.mrf.mxu0 }
  0xd7   :  { %2081 = vtanh.f32 %v397_v3  ;;  %v400_v6 = vmul.f32 0.5, %v254_v4  ;;  %v249_v7 = vadd.f32 %v2458_v60, %v248_v5 }
  0xd8   :  { %v1764_v8 = vpop.f32.mrf.mxu0 }
  0xd9   :  { %2083 = vtanh.f32 %v400_v6  ;;  %v399_v9 = vmul.f32 0.5, %v249_v7  ;;  %v264_v10 = vadd.f32 %v1764_v8, %v2458_v60 }
  0xda   :  { %v258_v11 = vpop.f32.mrf.mxu0 }
  0xdb   :  { %2085 = vtanh.f32 %v399_v9  ;;  %v402_v12 = vmul.f32 0.5, %v264_v10  ;;  %v259_v13 = vadd.f32 %v2458_v60, %v258_v11 }
  0xdc   :  { %v1767_v14 = vpop.f32.mrf.mxu0 }
  0xdd   :  { %2087 = vtanh.f32 %v402_v12  ;;  %v401_v15 = vmul.f32 0.5, %v259_v13  ;;  %v274_v16 = vadd.f32 %v1767_v14, %v2458_v60 }
  0xde   :  { %v268_v17 = vpop.f32.mrf.mxu0 }
  0xdf   :  { %2089 = vtanh.f32 %v401_v15  ;;  %v404_v18 = vmul.f32 0.5, %v274_v16  ;;  %v269_v19 = vadd.f32 %v2458_v60, %v268_v17 }
  0xe0   :  { %v1770_v20 = vpop.f32.mrf.mxu0 }
  0xe1   :  { %2091 = vtanh.f32 %v404_v18  ;;  %v403_v21 = vmul.f32 0.5, %v269_v19  ;;  %v284_v22 = vadd.f32 %v1770_v20, %v2458_v60 }
  0xe2   :  { %v2080_v23 = vpop.eup %2079  ;;  %v278_v24 = vpop.f32.mrf.mxu0 }
  0xe3   :  { %2093 = vtanh.f32 %v403_v21  ;;  %v406_v25 = vmul.f32 0.5, %v284_v22  ;;  %v279_v26 = vadd.f32 %v2458_v60, %v278_v24  ;;  %v462_v29 = vadd.f32 1.0, %v2080_v23 }
  0xe4   :  { %v2082_v27 = vpop.eup %2081  ;;  %v1773_v28 = vpop.f32.mrf.mxu0 }
  0xe5   :  { %2095 = vtanh.f32 %v406_v25  ;;  %v405_v30 = vmul.f32 0.5, %v279_v26  ;;  %v294_v31 = vadd.f32 %v1773_v28, %v2458_v60  ;;  %v461_v32 = vadd.f32 1.0, %v2082_v27 }
  0xe6   :  { %v2084_v33 = vpop.eup %2083  ;;  %v288_v34 = vpop.f32.mrf.mxu0  ;;  %v494_v40 = vmul.f32 0.5, %v462_v29 }
  0xe7   :  { %2097 = vtanh.f32 %v405_v30  ;;  %v408_v35 = vmul.f32 0.5, %v294_v31  ;;  %v289_v36 = vadd.f32 %v2458_v60, %v288_v34  ;;  %v493_v37 = vmul.f32 0.5, %v461_v32 }
  0xe8   :  { %v2086_v38 = vpop.eup %2085  ;;  %v1776_v39 = vpop.f32.mrf.mxu0  ;;  %v464_v41 = vadd.f32 1.0, %v2084_v33 }
  0xe9   :  { %2099 = vtanh.f32 %v408_v35  ;;  %v407_v42 = vmul.f32 0.5, %v289_v36  ;;  %v304_v43 = vadd.f32 %v1776_v39, %v2458_v60  ;;  %1836 = vmatprep.mubr.f32.mxu1 %v493_v37  ;;  %v463_v44 = vadd.f32 1.0, %v2086_v38 }
  0xea   :  { %v2088_v45 = vpop.eup %2087  ;;  %v298_v46 = vpop.f32.mrf.mxu0  ;;  %1837 = vmatmul.mubr.f32.vlgmr.msra.gmra.mxu1 %v494_v40  ;;  %v496_v52 = vmul.f32 0.5, %v464_v41 }
  0xeb   :  { %2101 = vtanh.f32 %v407_v42  ;;  %v410_v47 = vmul.f32 0.5, %v304_v43  ;;  %v299_v48 = vadd.f32 %v2458_v60, %v298_v46  ;;  %v495_v49 = vmul.f32 0.5, %v463_v44 }
  0xec   :  { %v2090_v50 = vpop.eup %2089  ;;  %v1779_v51 = vpop.f32.mrf.mxu0  ;;  %v466_v53 = vadd.f32 1.0, %v2088_v45 }
  0xed   :  { %2103 = vtanh.f32 %v410_v47  ;;  %v409_v54 = vmul.f32 0.5, %v299_v48  ;;  %v314_v55 = vadd.f32 %v1779_v51, %v2458_v60  ;;  %1839 = vmatprep.mubr.f32.mxu1 %v495_v49  ;;  %v465_v56 = vadd.f32 1.0, %v2090_v50 }
  0xee   :  { %v2092_v57 = vpop.eup %2091  ;;  %v308_v58 = vpop.f32.mrf.mxu0  ;;  %1840 = vmatmul.mubr.f32.gmra.mxu1 %v496_v52  ;;  %v498_v1 = vmul.f32 0.5, %v466_v53 }
  0xef   :  { %2105 = vtanh.f32 %v409_v54  ;;  %v412_v59 = vmul.f32 0.5, %v314_v55  ;;  %v309_v61 = vadd.f32 %v2458_v60, %v308_v58  ;;  %v497_v62 = vmul.f32 0.5, %v465_v56 }
  0xf0   :  { %v2094_v63 = vpop.eup %2093  ;;  %v1782_v0 = vpop.f32.mrf.mxu0  ;;  %v468_v2 = vadd.f32 1.0, %v2092_v57 }
  0xf1   :  { %2107 = vtanh.f32 %v412_v59  ;;  %v411_v3 = vmul.f32 0.5, %v309_v61  ;;  %v324_v4 = vadd.f32 %v1782_v0, %v2458_v60  ;;  %1842 = vmatprep.mubr.f32.mxu1 %v497_v62  ;;  %v467_v5 = vadd.f32 1.0, %v2094_v63 }
  0xf2   :  { %v2096_v6 = vpop.eup %2095  ;;  %v318_v7 = vpop.f32.mrf.mxu0  ;;  %1843 = vmatmul.mubr.f32.gmra.mxu1 %v498_v1  ;;  %v500_v13 = vmul.f32 0.5, %v468_v2 }
  0xf3   :  { %2109 = vtanh.f32 %v411_v3  ;;  %v414_v8 = vmul.f32 0.5, %v324_v4  ;;  %v319_v9 = vadd.f32 %v2458_v60, %v318_v7  ;;  %v499_v10 = vmul.f32 0.5, %v467_v5 }
  0xf4   :  { %v2098_v11 = vpop.eup %2097  ;;  %v1785_v12 = vpop.f32.mrf.mxu0  ;;  %v470_v14 = vadd.f32 1.0, %v2096_v6 }
  0xf5   :  { %2111 = vtanh.f32 %v414_v8  ;;  %v413_v15 = vmul.f32 0.5, %v319_v9  ;;  %v334_v16 = vadd.f32 %v1785_v12, %v2458_v60  ;;  %1845 = vmatprep.mubr.f32.mxu1 %v499_v10  ;;  %v469_v17 = vadd.f32 1.0, %v2098_v11 }
  0xf6   :  { %v2100_v18 = vpop.eup %2099  ;;  %v328_v19 = vpop.f32.mrf.mxu0  ;;  %1846 = vmatmul.mubr.f32.gmra.mxu1 %v500_v13  ;;  %v502_v25 = vmul.f32 0.5, %v470_v14 }
  0xf7   :  { %2113 = vtanh.f32 %v413_v15  ;;  %v416_v20 = vmul.f32 0.5, %v334_v16  ;;  %v329_v21 = vadd.f32 %v2458_v60, %v328_v19  ;;  %v501_v22 = vmul.f32 0.5, %v469_v17 }
  0xf8   :  { %v2102_v23 = vpop.eup %2101  ;;  %v1788_v24 = vpop.f32.mrf.mxu0  ;;  %v472_v26 = vadd.f32 1.0, %v2100_v18 }
  0xf9   :  { %2115 = vtanh.f32 %v416_v20  ;;  %v415_v27 = vmul.f32 0.5, %v329_v21  ;;  %v344_v28 = vadd.f32 %v1788_v24, %v2458_v60  ;;  %1848 = vmatprep.mubr.f32.mxu1 %v501_v22  ;;  %v471_v29 = vadd.f32 1.0, %v2102_v23 }
  0xfa   :  { %v2104_v30 = vpop.eup %2103  ;;  %v338_v31 = vpop.f32.mrf.mxu0  ;;  %1849 = vmatmul.mubr.f32.gmra.mxu1 %v502_v25  ;;  %v504_v37 = vmul.f32 0.5, %v472_v26 }
  0xfb   :  { %2117 = vtanh.f32 %v415_v27  ;;  %v418_v32 = vmul.f32 0.5, %v344_v28  ;;  %v339_v33 = vadd.f32 %v2458_v60, %v338_v31  ;;  %v503_v34 = vmul.f32 0.5, %v471_v29 }
  0xfc   :  { %v2106_v35 = vpop.eup %2105  ;;  %v1791_v36 = vpop.f32.mrf.mxu0  ;;  %v474_v38 = vadd.f32 1.0, %v2104_v30 }
  0xfd   :  { %2119 = vtanh.f32 %v418_v32  ;;  %v417_v39 = vmul.f32 0.5, %v339_v33  ;;  %v354_v40 = vadd.f32 %v1791_v36, %v2458_v60  ;;  %1851 = vmatprep.mubr.f32.mxu1 %v503_v34  ;;  %v473_v41 = vadd.f32 1.0, %v2106_v35 }
  0xfe   :  { %v2108_v42 = vpop.eup %2107  ;;  %v348_v43 = vpop.f32.mrf.mxu0  ;;  %1852 = vmatmul.mubr.f32.gmra.mxu1 %v504_v37  ;;  %v506_v49 = vmul.f32 0.5, %v474_v38 }
  0xff   :  { %2121 = vtanh.f32 %v417_v39  ;;  %v420_v44 = vmul.f32 0.5, %v354_v40  ;;  %v349_v45 = vadd.f32 %v2458_v60, %v348_v43  ;;  %v505_v46 = vmul.f32 0.5, %v473_v41 }
 0x100   :  { %v2110_v47 = vpop.eup %2109  ;;  %v1794_v48 = vpop.f32.mrf.mxu0  ;;  %v476_v50 = vadd.f32 1.0, %v2108_v42 }
 0x101   :  { %2123 = vtanh.f32 %v420_v44  ;;  %v419_v51 = vmul.f32 0.5, %v349_v45  ;;  %v364_v52 = vadd.f32 %v1794_v48, %v2458_v60  ;;  %1854 = vmatprep.mubr.f32.mxu1 %v505_v46  ;;  %v475_v53 = vadd.f32 1.0, %v2110_v47 }
 0x102   :  { %v2112_v54 = vpop.eup %2111  ;;  %v358_v55 = vpop.f32.mrf.mxu0  ;;  %1855 = vmatmul.mubr.f32.gmra.mxu1 %v506_v49  ;;  %v508_v62 = vmul.f32 0.5, %v476_v50 }
 0x103   :  { %2125 = vtanh.f32 %v419_v51  ;;  %v422_v56 = vmul.f32 0.5, %v364_v52  ;;  %v359_v57 = vadd.f32 %v2458_v60, %v358_v55  ;;  %v507_v58 = vmul.f32 0.5, %v475_v53 }
 0x104   :  { %v2114_v59 = vpop.eup %2113  ;;  %v1797_v61 = vpop.f32.mrf.mxu0  ;;  %v478_v63 = vadd.f32 1.0, %v2112_v54 }
 0x105   :  { %2127 = vtanh.f32 %v422_v56  ;;  %v421_v0 = vmul.f32 0.5, %v359_v57  ;;  %v374_v1 = vadd.f32 %v1797_v61, %v2458_v60  ;;  %1857 = vmatprep.mubr.f32.mxu1 %v507_v58  ;;  %v477_v2 = vadd.f32 1.0, %v2114_v59 }
 0x106   :  { %v2116_v3 = vpop.eup %2115  ;;  %v368_v4 = vpop.f32.mrf.mxu0  ;;  %1858 = vmatmul.mubr.f32.gmra.mxu1 %v508_v62  ;;  %v510_v10 = vmul.f32 0.5, %v478_v63  ;;  %v899_v63 = vld [vmem:[#allocation2 + $0xa0] sm:$0xff] }
 0x107   :  { %2129 = vtanh.f32 %v421_v0  ;;  %v424_v5 = vmul.f32 0.5, %v374_v1  ;;  %v369_v6 = vadd.f32 %v2458_v60, %v368_v4  ;;  %v509_v7 = vmul.f32 0.5, %v477_v2  ;;  %1906 = vmatprep.subr.mxu0 %v899_v63  ;;  %v898_v0 = vld [vmem:[#allocation2 + $0x98] sm:$0xff]  ;;  %v897_v1 = vld [vmem:[#allocation2 + $0x90] sm:$0xff]  ;;  %v896_v2 = vld [vmem:[#allocation2 + $0x88] sm:$0xff] }
 0x108   :  { %v2118_v8 = vpop.eup %2117  ;;  %v1800_v9 = vpop.f32.mrf.mxu0  ;;  %v480_v11 = vadd.f32 1.0, %v2116_v3  ;;  %1907 = vmatpush3.msra.mxu0 %v899_v63  ;;  %v895_v3 = vld [vmem:[#allocation2 + $0x80] sm:$0xff]  ;;  %v2492_v4 = vld [vmem:[#allocation2 + $0x178] sm:$0xff] }
 0x109   :  { %2131 = vtanh.f32 %v424_v5  ;;  %v423_v12 = vmul.f32 0.5, %v369_v6  ;;  %v384_v13 = vadd.f32 %v1800_v9, %v2458_v60  ;;  %1860 = vmatprep.mubr.f32.mxu1 %v509_v7  ;;  %v479_v14 = vadd.f32 1.0, %v2118_v8  ;;  %1908 = vmatprep.subr.mxu0 %v898_v0  ;;  %v2497_v5 = vld [vmem:[#allocation2 + $0x170] sm:$0xff]  ;;  %v2501_v6 = vld [vmem:[#allocation2 + $0x168] sm:$0xff]  ;;  %v2505_v7 = vld [vmem:[#allocation2 + $0x160] sm:$0xff] }
 0x10a   :  { %v2120_v15 = vpop.eup %2119  ;;  %v378_v16 = vpop.f32.mrf.mxu0  ;;  %1861 = vmatmul.mubr.f32.gmra.mxu1 %v510_v10  ;;  %v512_v22 = vmul.f32 0.5, %v480_v11  ;;  %1909 = vmatpush3.msra.mxu0 %v898_v0  ;;  %v2509_v8 = vld [vmem:[#allocation2 + $0x158] sm:$0xff]  ;;  %v2513_v9 = vld [vmem:[#allocation2 + $0x150] sm:$0xff]  ;;  %v2517_v10 = vld [vmem:[#allocation2 + $0x148] sm:$0xff] }
 0x10b   :  { %2133 = vtanh.f32 %v423_v12  ;;  %v426_v17 = vmul.f32 0.5, %v384_v13  ;;  %v379_v18 = vadd.f32 %v2458_v60, %v378_v16  ;;  %v511_v19 = vmul.f32 0.5, %v479_v14  ;;  %1910 = vmatprep.subr.mxu0 %v897_v1  ;;  %2044 = vmatprep.subr.mxu1 %v2492_v4  ;;  %v2521_v11 = vld [vmem:[#allocation2 + $0x140] sm:$0xff] }
 0x10c   :  { %v2122_v20 = vpop.eup %2121  ;;  %v1803_v21 = vpop.f32.mrf.mxu0  ;;  %v482_v23 = vadd.f32 1.0, %v2120_v15  ;;  %1911 = vmatpush3.msra.mxu0 %v897_v1  ;;  %2060 = vmatpush3.msra.mxu1 %v2492_v4 }
 0x10d   :  { %2135 = vtanh.f32 %v426_v17  ;;  %v425_v24 = vmul.f32 0.5, %v379_v18  ;;  %v394_v25 = vadd.f32 %v1803_v21, %v2458_v60  ;;  %1863 = vmatprep.mubr.f32.mxu1 %v511_v19  ;;  %v481_v26 = vadd.f32 1.0, %v2122_v20  ;;  %1912 = vmatprep.subr.mxu0 %v896_v2 }
 0x10e   :  { %v2124_v27 = vpop.eup %2123  ;;  %v388_v28 = vpop.f32.mrf.mxu0  ;;  %1864 = vmatmul.mubr.f32.gmra.mxu1 %v512_v22  ;;  %v514_v33 = vmul.f32 0.5, %v482_v23  ;;  %1913 = vmatpush3.msra.mxu0 %v896_v2 }
 0x10f   :  { %2137 = vtanh.f32 %v425_v24  ;;  %v428_v29 = vmul.f32 0.5, %v394_v25  ;;  %v389_v30 = vadd.f32 %v2458_v60, %v388_v28  ;;  %v513_v31 = vmul.f32 0.5, %v481_v26  ;;  %1914 = vmatprep.subr.mxu0 %v895_v3  ;;  %2045 = vmatprep.subr.mxu1 %v2497_v5 }
 0x110   :  { %v2126_v32 = vpop.eup %2125  ;;  %v484_v34 = vadd.f32 1.0, %v2124_v27  ;;  %1915 = vmatpush3.msra.mxu0 %v895_v3  ;;  %2061 = vmatpush3.msra.mxu1 %v2497_v5 }
 0x111   :  { %2139 = vtanh.f32 %v428_v29  ;;  %v427_v35 = vmul.f32 0.5, %v389_v30  ;;  %1866 = vmatprep.mubr.f32.mxu1 %v513_v31  ;;  %v483_v36 = vadd.f32 1.0, %v2126_v32  ;;  %1964 = vmatprep.subr.mxu0 %v2492_v4 }
 0x112   :  { %v2128_v37 = vpop.eup %2127  ;;  %1867 = vmatmul.mubr.f32.gmra.mxu1 %v514_v33  ;;  %v516_v40 = vmul.f32 0.5, %v484_v34  ;;  %2046 = vmatprep.subr.mxu1 %v2501_v6 }
 0x113   :  { %2141 = vtanh.f32 %v427_v35  ;;  %v515_v38 = vmul.f32 0.5, %v483_v36  ;;  %v486_v41 = vadd.f32 1.0, %v2128_v37  ;;  %2062 = vmatpush3.msra.mxu1 %v2501_v6 }
 0x114   :  { %v2130_v39 = vpop.eup %2129  ;;  %2047 = vmatprep.subr.mxu1 %v2505_v7 }
 0x115   :  { %1869 = vmatprep.mubr.f32.mxu1 %v515_v38  ;;  %v485_v42 = vadd.f32 1.0, %v2130_v39  ;;  %v518_v45 = vmul.f32 0.5, %v486_v41  ;;  %2063 = vmatpush3.msra.mxu1 %v2505_v7 }
 0x116   :  { %v2132_v43 = vpop.eup %2131  ;;  %1870 = vmatmul.mubr.f32.gmra.mxu1 %v516_v40  ;;  %2048 = vmatprep.subr.mxu1 %v2509_v8 }
 0x117   :  { %v517_v60 = vmul.f32 0.5, %v485_v42  ;;  %v488_v46 = vadd.f32 1.0, %v2132_v43  ;;  %2064 = vmatpush3.msra.mxu1 %v2509_v8 }
 0x118   :  { %v2134_v44 = vpop.eup %2133  ;;  %2049 = vmatprep.subr.mxu1 %v2513_v9 }
 0x119   :  { %1872 = vmatprep.mubr.f32.mxu1 %v517_v60  ;;  %v487_v47 = vadd.f32 1.0, %v2134_v44  ;;  %v520_v51 = vmul.f32 0.5, %v488_v46  ;;  %2065 = vmatpush3.msra.mxu1 %v2513_v9 }
 0x11a   :  { %v2136_v48 = vpop.eup %2135  ;;  %1873 = vmatmul.mubr.f32.gmra.mxu1 %v518_v45  ;;  %2050 = vmatprep.subr.mxu1 %v2517_v10 }
 0x11b   :  { %v519_v49 = vmul.f32 0.5, %v487_v47  ;;  %v490_v52 = vadd.f32 1.0, %v2136_v48  ;;  %2066 = vmatpush3.msra.mxu1 %v2517_v10 }
 0x11c   :  { %v2138_v50 = vpop.eup %2137  ;;  %2051 = vmatprep.subr.mxu1 %v2521_v11 }
 0x11d   :  { %1875 = vmatprep.mubr.f32.mxu1 %v519_v49  ;;  %v489_v53 = vadd.f32 1.0, %v2138_v50  ;;  %v522_v57 = vmul.f32 0.5, %v490_v52  ;;  %2067 = vmatpush3.msra.mxu1 %v2521_v11 }
 0x11e   :  { %v2140_v54 = vpop.eup %2139  ;;  %1876 = vmatmul.mubr.f32.gmra.mxu1 %v520_v51 }
 0x11f   :  { %v521_v55 = vmul.f32 0.5, %v489_v53  ;;  %v492_v58 = vadd.f32 1.0, %v2140_v54 }
 0x120   :  { %v2142_v56 = vpop.eup %2141 }
 0x121   :  { %1878 = vmatprep.mubr.f32.mxu1 %v521_v55  ;;  %v491_v59 = vadd.f32 1.0, %v2142_v56  ;;  %v524_v62 = vmul.f32 0.5, %v492_v58 }
 0x122   :  { %1879 = vmatmul.mubr.f32.gmra.mxu1 %v522_v57 }
 0x123   :  { %v523_v61 = vmul.f32 0.5, %v491_v59 }
 0x125   :  { %1881 = vmatprep.mubr.f32.mxu1 %v523_v61 }
 0x126   :  { %1882 = vmatmul.mubr.f32.gmra.mxu1 %v524_v62 }
 0x1aa   :  { %v1838_v12 = vpop.f32.mrf.mxu1 }
 0x1ab   :  { %v767_v13 = vmul.f32 0.5, %v1838_v12 }
 0x1ac   :  { %v607_v14 = vpop.f32.mrf.mxu1 }
 0x1ad   :  { %2143 = vtanh.f32 %v767_v13  ;;  %v766_v15 = vmul.f32 0.5, %v607_v14 }
 0x1ae   :  { %v1841_v16 = vpop.f32.mrf.mxu1 }
 0x1af   :  { %2145 = vtanh.f32 %v766_v15  ;;  %v769_v17 = vmul.f32 0.5, %v1841_v16 }
 0x1b0   :  { %v617_v18 = vpop.f32.mrf.mxu1 }
 0x1b1   :  { %2147 = vtanh.f32 %v769_v17  ;;  %v768_v19 = vmul.f32 0.5, %v617_v18 }
 0x1b2   :  { %v1844_v20 = vpop.f32.mrf.mxu1 }
 0x1b3   :  { %2149 = vtanh.f32 %v768_v19  ;;  %v771_v21 = vmul.f32 0.5, %v1844_v20 }
 0x1b4   :  { %v627_v22 = vpop.f32.mrf.mxu1 }
 0x1b5   :  { %2151 = vtanh.f32 %v771_v21  ;;  %v770_v23 = vmul.f32 0.5, %v627_v22 }
 0x1b6   :  { %v1847_v24 = vpop.f32.mrf.mxu1 }
 0x1b7   :  { %2153 = vtanh.f32 %v770_v23  ;;  %v773_v25 = vmul.f32 0.5, %v1847_v24 }
 0x1b8   :  { %v637_v26 = vpop.f32.mrf.mxu1 }
 0x1b9   :  { %2155 = vtanh.f32 %v773_v25  ;;  %v772_v27 = vmul.f32 0.5, %v637_v26 }
 0x1ba   :  { %v2144_v28 = vpop.eup %2143  ;;  %v1850_v29 = vpop.f32.mrf.mxu1 }
 0x1bb   :  { %2157 = vtanh.f32 %v772_v27  ;;  %v775_v30 = vmul.f32 0.5, %v1850_v29  ;;  %v831_v32 = vadd.f32 1.0, %v2144_v28 }
 0x1bc   :  { %v2146_v31 = vpop.eup %2145  ;;  %v647_v33 = vpop.f32.mrf.mxu1 }
 0x1bd   :  { %2159 = vtanh.f32 %v775_v30  ;;  %v774_v34 = vmul.f32 0.5, %v647_v33  ;;  %v830_v35 = vadd.f32 1.0, %v2146_v31  ;;  %v863_v41 = vmul.f32 0.5, %v831_v32 }
 0x1be   :  { %v2148_v36 = vpop.eup %2147  ;;  %v1853_v37 = vpop.f32.mrf.mxu1 }
 0x1bf   :  { %2161 = vtanh.f32 %v774_v34  ;;  %v777_v38 = vmul.f32 0.5, %v1853_v37  ;;  %v862_v39 = vmul.f32 0.5, %v830_v35  ;;  %v833_v43 = vadd.f32 1.0, %v2148_v36 }
 0x1c0   :  { %v2150_v40 = vpop.eup %2149  ;;  %v657_v42 = vpop.f32.mrf.mxu1 }
 0x1c1   :  { %2163 = vtanh.f32 %v777_v38  ;;  %v776_v60 = vmul.f32 0.5, %v657_v42  ;;  %1916 = vmatprep.mubr.f32.mxu0 %v862_v39  ;;  %v832_v44 = vadd.f32 1.0, %v2150_v40  ;;  %v865_v51 = vmul.f32 0.5, %v833_v43 }
 0x1c2   :  { %v2152_v45 = vpop.eup %2151  ;;  %v1856_v46 = vpop.f32.mrf.mxu1  ;;  %1917 = vmatmul.mubr.f32.vlgmr.msra.gmra.mxu0 %v863_v41 }
 0x1c3   :  { %2165 = vtanh.f32 %v776_v60  ;;  %v779_v47 = vmul.f32 0.5, %v1856_v46  ;;  %v864_v48 = vmul.f32 0.5, %v832_v44  ;;  %1965 = vmatpush3.msra.mxu0 %v2492_v4  ;;  %v835_v52 = vadd.f32 1.0, %v2152_v45 }
 0x1c4   :  { %v2154_v49 = vpop.eup %2153  ;;  %v667_v50 = vpop.f32.mrf.mxu1  ;;  %1966 = vmatprep.subr.mxu0 %v2497_v5 }
 0x1c5   :  { %2167 = vtanh.f32 %v779_v47  ;;  %v778_v53 = vmul.f32 0.5, %v667_v50  ;;  %1919 = vmatprep.mubr.f32.mxu0 %v864_v48  ;;  %v834_v54 = vadd.f32 1.0, %v2154_v49  ;;  %1967 = vmatpush3.msra.mxu0 %v2497_v5  ;;  %v867_v62 = vmul.f32 0.5, %v835_v52 }
 0x1c6   :  { %v2156_v55 = vpop.eup %2155  ;;  %v1859_v56 = vpop.f32.mrf.mxu1  ;;  %1920 = vmatmul.mubr.f32.gmra.mxu0 %v865_v51  ;;  %1968 = vmatprep.subr.mxu0 %v2501_v6 }
 0x1c7   :  { %2169 = vtanh.f32 %v778_v53  ;;  %v781_v57 = vmul.f32 0.5, %v1859_v56  ;;  %v866_v58 = vmul.f32 0.5, %v834_v54  ;;  %1969 = vmatpush3.msra.mxu0 %v2501_v6  ;;  %v837_v63 = vadd.f32 1.0, %v2156_v55 }
 0x1c8   :  { %v2158_v59 = vpop.eup %2157  ;;  %v677_v61 = vpop.f32.mrf.mxu1  ;;  %1970 = vmatprep.subr.mxu0 %v2505_v7 }
 0x1c9   :  { %2171 = vtanh.f32 %v781_v57  ;;  %v780_v0 = vmul.f32 0.5, %v677_v61  ;;  %1922 = vmatprep.mubr.f32.mxu0 %v866_v58  ;;  %v836_v1 = vadd.f32 1.0, %v2158_v59  ;;  %1971 = vmatpush3.msra.mxu0 %v2505_v7  ;;  %v869_v13 = vmul.f32 0.5, %v837_v63 }
 0x1ca   :  { %v2160_v2 = vpop.eup %2159  ;;  %v1862_v3 = vpop.f32.mrf.mxu1  ;;  %1923 = vmatmul.mubr.f32.gmra.mxu0 %v867_v62  ;;  %1972 = vmatprep.subr.mxu0 %v2509_v8 }
 0x1cb   :  { %2173 = vtanh.f32 %v780_v0  ;;  %v783_v4 = vmul.f32 0.5, %v1862_v3  ;;  %v868_v5 = vmul.f32 0.5, %v836_v1  ;;  %1973 = vmatpush3.msra.mxu0 %v2509_v8  ;;  %v839_v14 = vadd.f32 1.0, %v2160_v2 }
 0x1cc   :  { %v2162_v6 = vpop.eup %2161  ;;  %v687_v12 = vpop.f32.mrf.mxu1  ;;  %1974 = vmatprep.subr.mxu0 %v2513_v9 }
 0x1cd   :  { %2175 = vtanh.f32 %v783_v4  ;;  %v782_v15 = vmul.f32 0.5, %v687_v12  ;;  %1925 = vmatprep.mubr.f32.mxu0 %v868_v5  ;;  %v838_v7 = vadd.f32 1.0, %v2162_v6  ;;  %1975 = vmatpush3.msra.mxu0 %v2513_v9  ;;  %v871_v21 = vmul.f32 0.5, %v839_v14 }
 0x1ce   :  { %v2164_v16 = vpop.eup %2163  ;;  %v1865_v17 = vpop.f32.mrf.mxu1  ;;  %1926 = vmatmul.mubr.f32.gmra.mxu0 %v869_v13  ;;  %1976 = vmatprep.subr.mxu0 %v2517_v10 }
 0x1cf   :  { %2177 = vtanh.f32 %v782_v15  ;;  %v785_v18 = vmul.f32 0.5, %v1865_v17  ;;  %v870_v8 = vmul.f32 0.5, %v838_v7  ;;  %1977 = vmatpush3.msra.mxu0 %v2517_v10  ;;  %v841_v22 = vadd.f32 1.0, %v2164_v16 }
 0x1d0   :  { %v2166_v19 = vpop.eup %2165  ;;  %v697_v20 = vpop.f32.mrf.mxu1  ;;  %1978 = vmatprep.subr.mxu0 %v2521_v11 }
 0x1d1   :  { %2179 = vtanh.f32 %v785_v18  ;;  %v784_v23 = vmul.f32 0.5, %v697_v20  ;;  %1928 = vmatprep.mubr.f32.mxu0 %v870_v8  ;;  %v840_v9 = vadd.f32 1.0, %v2166_v19  ;;  %1979 = vmatpush3.msra.mxu0 %v2521_v11  ;;  %v873_v29 = vmul.f32 0.5, %v841_v22 }
 0x1d2   :  { %v2168_v24 = vpop.eup %2167  ;;  %v1868_v25 = vpop.f32.mrf.mxu1  ;;  %1929 = vmatmul.mubr.f32.gmra.mxu0 %v871_v21 }
 0x1d3   :  { %2181 = vtanh.f32 %v784_v23  ;;  %v787_v26 = vmul.f32 0.5, %v1868_v25  ;;  %v872_v27 = vmul.f32 0.5, %v840_v9  ;;  %v843_v30 = vadd.f32 1.0, %v2168_v24 }
 0x1d4   :  { %v2170_v28 = vpop.eup %2169  ;;  %v707_v10 = vpop.f32.mrf.mxu1 }
 0x1d5   :  { %2183 = vtanh.f32 %v787_v26  ;;  %v786_v31 = vmul.f32 0.5, %v707_v10  ;;  %1931 = vmatprep.mubr.f32.mxu0 %v872_v27  ;;  %v842_v32 = vadd.f32 1.0, %v2170_v28  ;;  %v875_v38 = vmul.f32 0.5, %v843_v30 }
 0x1d6   :  { %v2172_v33 = vpop.eup %2171  ;;  %v1871_v34 = vpop.f32.mrf.mxu1  ;;  %1932 = vmatmul.mubr.f32.gmra.mxu0 %v873_v29 }
 0x1d7   :  { %2185 = vtanh.f32 %v786_v31  ;;  %v789_v35 = vmul.f32 0.5, %v1871_v34  ;;  %v874_v11 = vmul.f32 0.5, %v842_v32  ;;  %v845_v39 = vadd.f32 1.0, %v2172_v33 }
 0x1d8   :  { %v2174_v36 = vpop.eup %2173  ;;  %v717_v37 = vpop.f32.mrf.mxu1 }
 0x1d9   :  { %2187 = vtanh.f32 %v789_v35  ;;  %v788_v40 = vmul.f32 0.5, %v717_v37  ;;  %1934 = vmatprep.mubr.f32.mxu0 %v874_v11  ;;  %v844_v41 = vadd.f32 1.0, %v2174_v36  ;;  %v877_v47 = vmul.f32 0.5, %v845_v39 }
 0x1da   :  { %v2176_v42 = vpop.eup %2175  ;;  %v1874_v43 = vpop.f32.mrf.mxu1  ;;  %1935 = vmatmul.mubr.f32.gmra.mxu0 %v875_v38 }
 0x1db   :  { %2189 = vtanh.f32 %v788_v40  ;;  %v791_v60 = vmul.f32 0.5, %v1874_v43  ;;  %v876_v44 = vmul.f32 0.5, %v844_v41  ;;  %v847_v48 = vadd.f32 1.0, %v2176_v42 }
 0x1dc   :  { %v2178_v45 = vpop.eup %2177  ;;  %v727_v46 = vpop.f32.mrf.mxu1 }
 0x1dd   :  { %2191 = vtanh.f32 %v791_v60  ;;  %v790_v49 = vmul.f32 0.5, %v727_v46  ;;  %1937 = vmatprep.mubr.f32.mxu0 %v876_v44  ;;  %v846_v50 = vadd.f32 1.0, %v2178_v45  ;;  %v879_v57 = vmul.f32 0.5, %v847_v48  ;;  %v1272_v60 = vld [vmem:[#allocation2 + $0x138] sm:$0xff]  ;;  %v1271_v44 = vld [vmem:[#allocation2 + $0x130] sm:$0xff]  ;;  %v1270_v45 = vld [vmem:[#allocation2 + $0x128] sm:$0xff] }
 0x1de   :  { %v2180_v51 = vpop.eup %2179  ;;  %v1877_v52 = vpop.f32.mrf.mxu1  ;;  %1938 = vmatmul.mubr.f32.gmra.mxu0 %v877_v47  ;;  %2052 = vmatprep.subr.mxu1 %v1272_v60  ;;  %v1269_v46 = vld [vmem:[#allocation2 + $0x120] sm:$0xff]  ;;  %v1268_v47 = vld [vmem:[#allocation2 + $0x118] sm:$0xff]  ;;  %v1267_v48 = vld [vmem:[#allocation2 + $0x110] sm:$0xff] }
 0x1df   :  { %2193 = vtanh.f32 %v790_v49  ;;  %v793_v53 = vmul.f32 0.5, %v1877_v52  ;;  %v878_v54 = vmul.f32 0.5, %v846_v50  ;;  %v849_v58 = vadd.f32 1.0, %v2180_v51  ;;  %1980 = vmatprep.subr.mxu0 %v1272_v60  ;;  %2068 = vmatpush3.msra.mxu1 %v1272_v60  ;;  %v1266_v49 = vld [vmem:[#allocation2 + $0x108] sm:$0xff]  ;;  %v1265_v50 = vld [vmem:[#allocation2 + $0x100] sm:$0xff] }
 0x1e0   :  { %v2182_v55 = vpop.eup %2181  ;;  %v737_v56 = vpop.f32.mrf.mxu1  ;;  %1981 = vmatpush3.msra.mxu0 %v1272_v60  ;;  %2053 = vmatprep.subr.mxu1 %v1271_v44 }
 0x1e1   :  { %2195 = vtanh.f32 %v793_v53  ;;  %v792_v59 = vmul.f32 0.5, %v737_v56  ;;  %1940 = vmatprep.mubr.f32.mxu0 %v878_v54  ;;  %v848_v61 = vadd.f32 1.0, %v2182_v55  ;;  %v881_v4 = vmul.f32 0.5, %v849_v58  ;;  %1982 = vmatprep.subr.mxu0 %v1271_v44 }
 0x1e2   :  { %v2184_v62 = vpop.eup %2183  ;;  %v1880_v63 = vpop.f32.mrf.mxu1  ;;  %1941 = vmatmul.mubr.f32.gmra.mxu0 %v879_v57  ;;  %2069 = vmatpush3.msra.mxu1 %v1271_v44 }
 0x1e3   :  { %2197 = vtanh.f32 %v792_v59  ;;  %v795_v0 = vmul.f32 0.5, %v1880_v63  ;;  %v880_v1 = vmul.f32 0.5, %v848_v61  ;;  %v851_v5 = vadd.f32 1.0, %v2184_v62  ;;  %1983 = vmatpush3.msra.mxu0 %v1271_v44  ;;  %2054 = vmatprep.subr.mxu1 %v1270_v45 }
 0x1e4   :  { %v2186_v2 = vpop.eup %2185  ;;  %v747_v3 = vpop.f32.mrf.mxu1  ;;  %1984 = vmatprep.subr.mxu0 %v1270_v45  ;;  %2070 = vmatpush3.msra.mxu1 %v1270_v45 }
 0x1e5   :  { %2199 = vtanh.f32 %v795_v0  ;;  %v794_v6 = vmul.f32 0.5, %v747_v3  ;;  %1943 = vmatprep.mubr.f32.mxu0 %v880_v1  ;;  %v850_v12 = vadd.f32 1.0, %v2186_v2  ;;  %v883_v18 = vmul.f32 0.5, %v851_v5  ;;  %1985 = vmatpush3.msra.mxu0 %v1270_v45 }
 0x1e6   :  { %v2188_v13 = vpop.eup %2187  ;;  %v1883_v14 = vpop.f32.mrf.mxu1  ;;  %1944 = vmatmul.mubr.f32.gmra.mxu0 %v881_v4  ;;  %1986 = vmatprep.subr.mxu0 %v1269_v46 }
 0x1e7   :  { %2201 = vtanh.f32 %v794_v6  ;;  %v797_v15 = vmul.f32 0.5, %v1883_v14  ;;  %v882_v7 = vmul.f32 0.5, %v850_v12  ;;  %v853_v8 = vadd.f32 1.0, %v2188_v13  ;;  %2055 = vmatprep.subr.mxu1 %v1269_v46  ;;  %1987 = vmatpush3.msra.mxu0 %v1269_v46 }
 0x1e8   :  { %v2190_v16 = vpop.eup %2189  ;;  %v757_v17 = vpop.f32.mrf.mxu1  ;;  %2071 = vmatpush3.msra.mxu1 %v1269_v46  ;;  %1988 = vmatprep.subr.mxu0 %v1268_v47 }
 0x1e9   :  { %2203 = vtanh.f32 %v797_v15  ;;  %v796_v19 = vmul.f32 0.5, %v757_v17  ;;  %1946 = vmatprep.mubr.f32.mxu0 %v882_v7  ;;  %v852_v20 = vadd.f32 1.0, %v2190_v16  ;;  %v885_v9 = vmul.f32 0.5, %v853_v8  ;;  %2056 = vmatprep.subr.mxu1 %v1268_v47 }
 0x1ea   :  { %v2192_v21 = vpop.eup %2191  ;;  %1947 = vmatmul.mubr.f32.gmra.mxu0 %v883_v18  ;;  %2072 = vmatpush3.msra.mxu1 %v1268_v47 }
 0x1eb   :  { %2205 = vtanh.f32 %v796_v19  ;;  %v884_v22 = vmul.f32 0.5, %v852_v20  ;;  %v855_v24 = vadd.f32 1.0, %v2192_v21  ;;  %1989 = vmatpush3.msra.mxu0 %v1268_v47  ;;  %2057 = vmatprep.subr.mxu1 %v1267_v48 }
 0x1ec   :  { %v2194_v23 = vpop.eup %2193  ;;  %1990 = vmatprep.subr.mxu0 %v1267_v48  ;;  %2073 = vmatpush3.msra.mxu1 %v1267_v48 }
 0x1ed   :  { %1949 = vmatprep.mubr.f32.mxu0 %v884_v22  ;;  %v854_v25 = vadd.f32 1.0, %v2194_v23  ;;  %v887_v10 = vmul.f32 0.5, %v855_v24  ;;  %1991 = vmatpush3.msra.mxu0 %v1267_v48 }
 0x1ee   :  { %v2196_v26 = vpop.eup %2195  ;;  %1950 = vmatmul.mubr.f32.gmra.mxu0 %v885_v9  ;;  %1992 = vmatprep.subr.mxu0 %v1266_v49 }
 0x1ef   :  { %v886_v27 = vmul.f32 0.5, %v854_v25  ;;  %v857_v29 = vadd.f32 1.0, %v2196_v26  ;;  %2058 = vmatprep.subr.mxu1 %v1266_v49  ;;  %1993 = vmatpush3.msra.mxu0 %v1266_v49 }
 0x1f0   :  { %v2198_v28 = vpop.eup %2197  ;;  %2074 = vmatpush3.msra.mxu1 %v1266_v49  ;;  %1994 = vmatprep.subr.mxu0 %v1265_v50 }
 0x1f1   :  { %1952 = vmatprep.mubr.f32.mxu0 %v886_v27  ;;  %v856_v30 = vadd.f32 1.0, %v2198_v28  ;;  %v889_v34 = vmul.f32 0.5, %v857_v29  ;;  %2059 = vmatprep.subr.mxu1 %v1265_v50 }
 0x1f2   :  { %v2200_v31 = vpop.eup %2199  ;;  %1953 = vmatmul.mubr.f32.gmra.mxu0 %v887_v10  ;;  %2075 = vmatpush3.msra.mxu1 %v1265_v50 }
 0x1f3   :  { %v888_v32 = vmul.f32 0.5, %v856_v30  ;;  %v859_v35 = vadd.f32 1.0, %v2200_v31  ;;  %1995 = vmatpush3.msra.mxu0 %v1265_v50 }
 0x1f4   :  { %v2202_v33 = vpop.eup %2201 }
 0x1f5   :  { %1955 = vmatprep.mubr.f32.mxu0 %v888_v32  ;;  %v858_v11 = vadd.f32 1.0, %v2202_v33  ;;  %v891_v39 = vmul.f32 0.5, %v859_v35 }
 0x1f6   :  { %v2204_v36 = vpop.eup %2203  ;;  %1956 = vmatmul.mubr.f32.gmra.mxu0 %v889_v34 }
 0x1f7   :  { %v890_v37 = vmul.f32 0.5, %v858_v11  ;;  %v861_v40 = vadd.f32 1.0, %v2204_v36 }
 0x1f8   :  { %v2206_v38 = vpop.eup %2205 }
 0x1f9   :  { %1958 = vmatprep.mubr.f32.mxu0 %v890_v37  ;;  %v860_v41 = vadd.f32 1.0, %v2206_v38  ;;  %v893_v43 = vmul.f32 0.5, %v861_v40 }
 0x1fa   :  { %1959 = vmatmul.mubr.f32.gmra.mxu0 %v891_v39 }
 0x1fb   :  { %v892_v42 = vmul.f32 0.5, %v860_v41 }
 0x1fd   :  { %1961 = vmatprep.mubr.f32.mxu0 %v892_v42 }
 0x1fe   :  { %1962 = vmatmul.mubr.f32.gmra.mxu0 %v893_v43 }
 0x282   :  { %v1918_v51 = vpop.f32.mrf.mxu0 }
 0x283   :  { %v1137_v52 = vmul.f32 0.5, %v1918_v51 }
 0x284   :  { %v977_v53 = vpop.f32.mrf.mxu0 }
 0x285   :  { %2207 = vtanh.f32 %v1137_v52  ;;  %v1136_v54 = vmul.f32 0.5, %v977_v53 }
 0x286   :  { %v1921_v55 = vpop.f32.mrf.mxu0 }
 0x287   :  { %2209 = vtanh.f32 %v1136_v54  ;;  %v1139_v56 = vmul.f32 0.5, %v1921_v55 }
 0x288   :  { %v987_v57 = vpop.f32.mrf.mxu0 }
 0x289   :  { %2211 = vtanh.f32 %v1139_v56  ;;  %v1138_v58 = vmul.f32 0.5, %v987_v57 }
 0x28a   :  { %v1924_v59 = vpop.f32.mrf.mxu0 }
 0x28b   :  { %2213 = vtanh.f32 %v1138_v58  ;;  %v1141_v61 = vmul.f32 0.5, %v1924_v59 }
 0x28c   :  { %v997_v62 = vpop.f32.mrf.mxu0 }
 0x28d   :  { %2215 = vtanh.f32 %v1141_v61  ;;  %v1140_v63 = vmul.f32 0.5, %v997_v62 }
 0x28e   :  { %v1927_v0 = vpop.f32.mrf.mxu0 }
 0x28f   :  { %2217 = vtanh.f32 %v1140_v63  ;;  %v1143_v1 = vmul.f32 0.5, %v1927_v0 }
 0x290   :  { %v1007_v2 = vpop.f32.mrf.mxu0 }
 0x291   :  { %2219 = vtanh.f32 %v1143_v1  ;;  %v1142_v3 = vmul.f32 0.5, %v1007_v2 }
 0x292   :  { %v2208_v4 = vpop.eup %2207  ;;  %v1930_v5 = vpop.f32.mrf.mxu0 }
 0x293   :  { %2221 = vtanh.f32 %v1142_v3  ;;  %v1145_v6 = vmul.f32 0.5, %v1930_v5  ;;  %v1201_v13 = vadd.f32 1.0, %v2208_v4 }
 0x294   :  { %v2210_v12 = vpop.eup %2209  ;;  %v1017_v14 = vpop.f32.mrf.mxu0 }
 0x295   :  { %2223 = vtanh.f32 %v1145_v6  ;;  %v1144_v15 = vmul.f32 0.5, %v1017_v14  ;;  %v1200_v7 = vadd.f32 1.0, %v2210_v12  ;;  %v1233_v20 = vmul.f32 0.5, %v1201_v13 }
 0x296   :  { %v2212_v16 = vpop.eup %2211  ;;  %v1933_v17 = vpop.f32.mrf.mxu0 }
 0x297   :  { %2225 = vtanh.f32 %v1144_v15  ;;  %v1147_v18 = vmul.f32 0.5, %v1933_v17  ;;  %v1232_v8 = vmul.f32 0.5, %v1200_v7  ;;  %v1203_v22 = vadd.f32 1.0, %v2212_v16 }
 0x298   :  { %v2214_v19 = vpop.eup %2213  ;;  %v1027_v21 = vpop.f32.mrf.mxu0 }
 0x299   :  { %2227 = vtanh.f32 %v1147_v18  ;;  %v1146_v23 = vmul.f32 0.5, %v1027_v21  ;;  %1996 = vmatprep.mubr.f32.mxu0 %v1232_v8  ;;  %v1202_v9 = vadd.f32 1.0, %v2214_v19  ;;  %v1235_v29 = vmul.f32 0.5, %v1203_v22 }
 0x29a   :  { %v2216_v24 = vpop.eup %2215  ;;  %v1936_v25 = vpop.f32.mrf.mxu0  ;;  %1997 = vmatmul.mubr.f32.vlgmr.msra.gmra.mxu0 %v1233_v20 }
 0x29b   :  { %2229 = vtanh.f32 %v1146_v23  ;;  %v1149_v26 = vmul.f32 0.5, %v1936_v25  ;;  %v1234_v27 = vmul.f32 0.5, %v1202_v9  ;;  %v1205_v30 = vadd.f32 1.0, %v2216_v24 }
 0x29c   :  { %v2218_v28 = vpop.eup %2217  ;;  %v1037_v10 = vpop.f32.mrf.mxu0 }
 0x29d   :  { %2231 = vtanh.f32 %v1149_v26  ;;  %v1148_v31 = vmul.f32 0.5, %v1037_v10  ;;  %1999 = vmatprep.mubr.f32.mxu0 %v1234_v27  ;;  %v1204_v32 = vadd.f32 1.0, %v2218_v28  ;;  %v1237_v39 = vmul.f32 0.5, %v1205_v30 }
 0x29e   :  { %v2220_v33 = vpop.eup %2219  ;;  %v1939_v34 = vpop.f32.mrf.mxu0  ;;  %2000 = vmatmul.mubr.f32.gmra.mxu0 %v1235_v29 }
 0x29f   :  { %2233 = vtanh.f32 %v1148_v31  ;;  %v1151_v35 = vmul.f32 0.5, %v1939_v34  ;;  %v1236_v11 = vmul.f32 0.5, %v1204_v32  ;;  %v1207_v37 = vadd.f32 1.0, %v2220_v33 }
 0x2a0   :  { %v2222_v36 = vpop.eup %2221  ;;  %v1047_v38 = vpop.f32.mrf.mxu0 }
 0x2a1   :  { %2235 = vtanh.f32 %v1151_v35  ;;  %v1150_v40 = vmul.f32 0.5, %v1047_v38  ;;  %2002 = vmatprep.mubr.f32.mxu0 %v1236_v11  ;;  %v1206_v41 = vadd.f32 1.0, %v2222_v36  ;;  %v1239_v46 = vmul.f32 0.5, %v1207_v37 }
 0x2a2   :  { %v2224_v42 = vpop.eup %2223  ;;  %v1942_v43 = vpop.f32.mrf.mxu0  ;;  %2003 = vmatmul.mubr.f32.gmra.mxu0 %v1237_v39 }
 0x2a3   :  { %2237 = vtanh.f32 %v1150_v40  ;;  %v1153_v60 = vmul.f32 0.5, %v1942_v43  ;;  %v1238_v44 = vmul.f32 0.5, %v1206_v41  ;;  %v1209_v48 = vadd.f32 1.0, %v2224_v42 }
 0x2a4   :  { %v2226_v45 = vpop.eup %2225  ;;  %v1057_v47 = vpop.f32.mrf.mxu0 }
 0x2a5   :  { %2239 = vtanh.f32 %v1153_v60  ;;  %v1152_v49 = vmul.f32 0.5, %v1057_v47  ;;  %2005 = vmatprep.mubr.f32.mxu1 %v1238_v44  ;;  %v1208_v50 = vadd.f32 1.0, %v2226_v45  ;;  %v1241_v57 = vmul.f32 0.5, %v1209_v48 }
 0x2a6   :  { %v2228_v51 = vpop.eup %2227  ;;  %v1945_v52 = vpop.f32.mrf.mxu0  ;;  %2006 = vmatmul.mubr.f32.vlgmr.msra.gmra.mxu1 %v1239_v46 }
 0x2a7   :  { %2241 = vtanh.f32 %v1152_v49  ;;  %v1155_v53 = vmul.f32 0.5, %v1945_v52  ;;  %v1240_v54 = vmul.f32 0.5, %v1208_v50  ;;  %v1211_v58 = vadd.f32 1.0, %v2228_v51 }
 0x2a8   :  { %v2230_v55 = vpop.eup %2229  ;;  %v1067_v56 = vpop.f32.mrf.mxu0 }
 0x2a9   :  { %2243 = vtanh.f32 %v1155_v53  ;;  %v1154_v59 = vmul.f32 0.5, %v1067_v56  ;;  %2008 = vmatprep.mubr.f32.mxu1 %v1240_v54  ;;  %v1210_v61 = vadd.f32 1.0, %v2230_v55  ;;  %v1243_v4 = vmul.f32 0.5, %v1211_v58 }
 0x2aa   :  { %v2232_v62 = vpop.eup %2231  ;;  %v1948_v63 = vpop.f32.mrf.mxu0  ;;  %2009 = vmatmul.mubr.f32.gmra.mxu1 %v1241_v57 }
 0x2ab   :  { %2245 = vtanh.f32 %v1154_v59  ;;  %v1157_v0 = vmul.f32 0.5, %v1948_v63  ;;  %v1242_v1 = vmul.f32 0.5, %v1210_v61  ;;  %v1213_v5 = vadd.f32 1.0, %v2232_v62 }
 0x2ac   :  { %v2234_v2 = vpop.eup %2233  ;;  %v1077_v3 = vpop.f32.mrf.mxu0 }
 0x2ad   :  { %2247 = vtanh.f32 %v1157_v0  ;;  %v1156_v6 = vmul.f32 0.5, %v1077_v3  ;;  %2011 = vmatprep.mubr.f32.mxu1 %v1242_v1  ;;  %v1212_v12 = vadd.f32 1.0, %v2234_v2  ;;  %v1245_v18 = vmul.f32 0.5, %v1213_v5 }
 0x2ae   :  { %v2236_v13 = vpop.eup %2235  ;;  %v1951_v14 = vpop.f32.mrf.mxu0  ;;  %2012 = vmatmul.mubr.f32.gmra.mxu1 %v1243_v4 }
 0x2af   :  { %2249 = vtanh.f32 %v1156_v6  ;;  %v1159_v15 = vmul.f32 0.5, %v1951_v14  ;;  %v1244_v7 = vmul.f32 0.5, %v1212_v12  ;;  %v1215_v8 = vadd.f32 1.0, %v2236_v13 }
 0x2b0   :  { %v2238_v16 = vpop.eup %2237  ;;  %v1087_v17 = vpop.f32.mrf.mxu0 }
 0x2b1   :  { %2251 = vtanh.f32 %v1159_v15  ;;  %v1158_v19 = vmul.f32 0.5, %v1087_v17  ;;  %2014 = vmatprep.mubr.f32.mxu1 %v1244_v7  ;;  %v1214_v20 = vadd.f32 1.0, %v2238_v16  ;;  %v1247_v26 = vmul.f32 0.5, %v1215_v8 }
 0x2b2   :  { %v2240_v21 = vpop.eup %2239  ;;  %v1954_v22 = vpop.f32.mrf.mxu0  ;;  %2015 = vmatmul.mubr.f32.gmra.mxu1 %v1245_v18 }
 0x2b3   :  { %2253 = vtanh.f32 %v1158_v19  ;;  %v1161_v23 = vmul.f32 0.5, %v1954_v22  ;;  %v1246_v9 = vmul.f32 0.5, %v1214_v20  ;;  %v1217_v27 = vadd.f32 1.0, %v2240_v21 }
 0x2b4   :  { %v2242_v24 = vpop.eup %2241  ;;  %v1097_v25 = vpop.f32.mrf.mxu0 }
 0x2b5   :  { %2255 = vtanh.f32 %v1161_v23  ;;  %v1160_v28 = vmul.f32 0.5, %v1097_v25  ;;  %2017 = vmatprep.mubr.f32.mxu1 %v1246_v9  ;;  %v1216_v10 = vadd.f32 1.0, %v2242_v24  ;;  %v1249_v35 = vmul.f32 0.5, %v1217_v27 }
 0x2b6   :  { %v2244_v29 = vpop.eup %2243  ;;  %v1957_v30 = vpop.f32.mrf.mxu0  ;;  %2018 = vmatmul.mubr.f32.gmra.mxu1 %v1247_v26 }
 0x2b7   :  { %2257 = vtanh.f32 %v1160_v28  ;;  %v1163_v31 = vmul.f32 0.5, %v1957_v30  ;;  %v1248_v32 = vmul.f32 0.5, %v1216_v10  ;;  %v1219_v11 = vadd.f32 1.0, %v2244_v29 }
 0x2b8   :  { %v2246_v33 = vpop.eup %2245  ;;  %v1107_v34 = vpop.f32.mrf.mxu0 }
 0x2b9   :  { %2259 = vtanh.f32 %v1163_v31  ;;  %v1162_v36 = vmul.f32 0.5, %v1107_v34  ;;  %2020 = vmatprep.mubr.f32.mxu1 %v1248_v32  ;;  %v1218_v37 = vadd.f32 1.0, %v2246_v33  ;;  %v1251_v60 = vmul.f32 0.5, %v1219_v11 }
 0x2ba   :  { %v2248_v38 = vpop.eup %2247  ;;  %v1960_v39 = vpop.f32.mrf.mxu0  ;;  %2021 = vmatmul.mubr.f32.gmra.mxu1 %v1249_v35 }
 0x2bb   :  { %2261 = vtanh.f32 %v1162_v36  ;;  %v1165_v40 = vmul.f32 0.5, %v1960_v39  ;;  %v1250_v41 = vmul.f32 0.5, %v1218_v37  ;;  %v1221_v44 = vadd.f32 1.0, %v2248_v38 }
 0x2bc   :  { %v2250_v42 = vpop.eup %2249  ;;  %v1117_v43 = vpop.f32.mrf.mxu0 }
 0x2bd   :  { %2263 = vtanh.f32 %v1165_v40  ;;  %v1164_v45 = vmul.f32 0.5, %v1117_v43  ;;  %2023 = vmatprep.mubr.f32.mxu1 %v1250_v41  ;;  %v1220_v46 = vadd.f32 1.0, %v2250_v42  ;;  %v1253_v53 = vmul.f32 0.5, %v1221_v44 }
 0x2be   :  { %v2252_v47 = vpop.eup %2251  ;;  %v1963_v48 = vpop.f32.mrf.mxu0  ;;  %2024 = vmatmul.mubr.f32.gmra.mxu1 %v1251_v60 }
 0x2bf   :  { %2265 = vtanh.f32 %v1164_v45  ;;  %v1167_v49 = vmul.f32 0.5, %v1963_v48  ;;  %v1252_v50 = vmul.f32 0.5, %v1220_v46  ;;  %v1223_v54 = vadd.f32 1.0, %v2252_v47 }
 0x2c0   :  { %v2254_v51 = vpop.eup %2253  ;;  %v1127_v52 = vpop.f32.mrf.mxu0 }
 0x2c1   :  { %2267 = vtanh.f32 %v1167_v49  ;;  %v1166_v55 = vmul.f32 0.5, %v1127_v52  ;;  %2026 = vmatprep.mubr.f32.mxu1 %v1252_v50  ;;  %v1222_v56 = vadd.f32 1.0, %v2254_v51  ;;  %v1255_v61 = vmul.f32 0.5, %v1223_v54 }
 0x2c2   :  { %v2256_v57 = vpop.eup %2255  ;;  %2027 = vmatmul.mubr.f32.gmra.mxu1 %v1253_v53 }
 0x2c3   :  { %2269 = vtanh.f32 %v1166_v55  ;;  %v1254_v58 = vmul.f32 0.5, %v1222_v56  ;;  %v1225_v62 = vadd.f32 1.0, %v2256_v57 }
 0x2c4   :  { %v2258_v59 = vpop.eup %2257 }
 0x2c5   :  { %2029 = vmatprep.mubr.f32.mxu1 %v1254_v58  ;;  %v1224_v63 = vadd.f32 1.0, %v2258_v59  ;;  %v1257_v3 = vmul.f32 0.5, %v1225_v62 }
 0x2c6   :  { %v2260_v0 = vpop.eup %2259  ;;  %2030 = vmatmul.mubr.f32.gmra.mxu1 %v1255_v61 }
 0x2c7   :  { %v1256_v1 = vmul.f32 0.5, %v1224_v63  ;;  %v1227_v4 = vadd.f32 1.0, %v2260_v0 }
 0x2c8   :  { %v2262_v2 = vpop.eup %2261 }
 0x2c9   :  { %2032 = vmatprep.mubr.f32.mxu1 %v1256_v1  ;;  %v1226_v5 = vadd.f32 1.0, %v2262_v2  ;;  %v1259_v14 = vmul.f32 0.5, %v1227_v4 }
 0x2ca   :  { %v2264_v6 = vpop.eup %2263  ;;  %2033 = vmatmul.mubr.f32.gmra.mxu1 %v1257_v3 }
 0x2cb   :  { %v1258_v12 = vmul.f32 0.5, %v1226_v5  ;;  %v1229_v15 = vadd.f32 1.0, %v2264_v6 }
 0x2cc   :  { %v2266_v13 = vpop.eup %2265 }
 0x2cd   :  { %2035 = vmatprep.mubr.f32.mxu1 %v1258_v12  ;;  %v1228_v7 = vadd.f32 1.0, %v2266_v13  ;;  %v1261_v8 = vmul.f32 0.5, %v1229_v15 }
 0x2ce   :  { %v2268_v16 = vpop.eup %2267  ;;  %2036 = vmatmul.mubr.f32.gmra.mxu1 %v1259_v14 }
 0x2cf   :  { %v1260_v17 = vmul.f32 0.5, %v1228_v7  ;;  %v1231_v19 = vadd.f32 1.0, %v2268_v16 }
 0x2d0   :  { %v2270_v18 = vpop.eup %2269 }
 0x2d1   :  { %2038 = vmatprep.mubr.f32.mxu1 %v1260_v17  ;;  %v1230_v20 = vadd.f32 1.0, %v2270_v18  ;;  %v1263_v22 = vmul.f32 0.5, %v1231_v19 }
 0x2d2   :  { %2039 = vmatmul.mubr.f32.gmra.mxu1 %v1261_v8 }
 0x2d3   :  { %v1262_v21 = vmul.f32 0.5, %v1230_v20 }
 0x2d5   :  { %2041 = vmatprep.mubr.f32.mxu1 %v1262_v21 }
 0x2d6   :  { %2042 = vmatmul.mubr.f32.gmra.mxu1 %v1263_v22 }
 0x35a   :  { %v1998_v23 = vpop.f32.mrf.mxu0 }
 0x35b   :  { %1507 = vst.msk [vmem:[%s2672_s4 + $0x8] sm:$0xff] %vm71_vm1, %v1998_v23 }
 0x35c   :  { %v1347_v9 = vpop.f32.mrf.mxu0 }
 0x35d   :  { %1506 = vst.msk [vmem:[%s2672_s4] sm:$0xff] %vm71_vm1, %v1347_v9 }
 0x35e   :  { %v2001_v24 = vpop.f32.mrf.mxu0 }
 0x35f   :  { %1509 = vst.msk [vmem:[%s2672_s4 + $0x18] sm:$0xff] %vm71_vm1, %v2001_v24 }
 0x360   :  { %v1357_v25 = vpop.f32.mrf.mxu0 }
 0x361   :  { %1508 = vst.msk [vmem:[%s2672_s4 + $0x10] sm:$0xff] %vm71_vm1, %v1357_v25 }
 0x362   :  { %v2004_v26 = vpop.f32.mrf.mxu0 }
 0x363   :  { %1511 = vst.msk [vmem:[%s2672_s4 + $0x28] sm:$0xff] %vm71_vm1, %v2004_v26 }
 0x364   :  { %v1367_v27 = vpop.f32.mrf.mxu0 }
 0x365   :  { %1510 = vst.msk [vmem:[%s2672_s4 + $0x20] sm:$0xff] %vm71_vm1, %v1367_v27 }
 0x366   :  { %v2007_v28 = vpop.f32.mrf.mxu1 }
 0x367   :  { %1513 = vst.msk [vmem:[%s2672_s4 + $0x38] sm:$0xff] %vm71_vm1, %v2007_v28 }
 0x368   :  { %v1377_v10 = vpop.f32.mrf.mxu1 }
 0x369   :  { %1512 = vst.msk [vmem:[%s2672_s4 + $0x30] sm:$0xff] %vm71_vm1, %v1377_v10 }
 0x36a   :  { %v2010_v29 = vpop.f32.mrf.mxu1 }
 0x36b   :  { %1515 = vst.msk [vmem:[%s2672_s4 + $0x48] sm:$0xff] %vm71_vm1, %v2010_v29 }
 0x36c   :  { %v1387_v30 = vpop.f32.mrf.mxu1 }
 0x36d   :  { %1514 = vst.msk [vmem:[%s2672_s4 + $0x40] sm:$0xff] %vm71_vm1, %v1387_v30 }
 0x36e   :  { %v2013_v31 = vpop.f32.mrf.mxu1 }
 0x36f   :  { %1517 = vst.msk [vmem:[%s2672_s4 + $0x58] sm:$0xff] %vm71_vm1, %v2013_v31 }
 0x370   :  { %v1397_v32 = vpop.f32.mrf.mxu1 }
 0x371   :  { %1516 = vst.msk [vmem:[%s2672_s4 + $0x50] sm:$0xff] %vm71_vm1, %v1397_v32 }
 0x372   :  { %v2016_v33 = vpop.f32.mrf.mxu1 }
 0x373   :  { %1519 = vst.msk [vmem:[%s2672_s4 + $0x68] sm:$0xff] %vm71_vm1, %v2016_v33 }
 0x374   :  { %v1407_v34 = vpop.f32.mrf.mxu1 }
 0x375   :  { %1518 = vst.msk [vmem:[%s2672_s4 + $0x60] sm:$0xff] %vm71_vm1, %v1407_v34 }
 0x376   :  { %v2019_v35 = vpop.f32.mrf.mxu1 }
 0x377   :  { %1521 = vst.msk [vmem:[%s2672_s4 + $0x78] sm:$0xff] %vm71_vm1, %v2019_v35 }
 0x378   :  { %v1417_v11 = vpop.f32.mrf.mxu1 }
 0x379   :  { %1520 = vst.msk [vmem:[%s2672_s4 + $0x70] sm:$0xff] %vm71_vm1, %v1417_v11 }
 0x37a   :  { %v2022_v36 = vpop.f32.mrf.mxu1 }
 0x37b   :  { %1523 = vst.msk [vmem:[%s2672_s4 + $0x88] sm:$0xff] %vm71_vm1, %v2022_v36 }
 0x37c   :  { %v1427_v37 = vpop.f32.mrf.mxu1 }
 0x37d   :  { %1522 = vst.msk [vmem:[%s2672_s4 + $0x80] sm:$0xff] %vm71_vm1, %v1427_v37 }
 0x37e   :  { %v2025_v38 = vpop.f32.mrf.mxu1 }
 0x37f   :  { %1525 = vst.msk [vmem:[%s2672_s4 + $0x98] sm:$0xff] %vm71_vm1, %v2025_v38 }
 0x380   :  { %v1437_v39 = vpop.f32.mrf.mxu1 }
 0x381   :  { %1524 = vst.msk [vmem:[%s2672_s4 + $0x90] sm:$0xff] %vm71_vm1, %v1437_v39 }
 0x382   :  { %v2028_v40 = vpop.f32.mrf.mxu1 }
 0x383   :  { %1527 = vst.msk [vmem:[%s2672_s4 + $0xa8] sm:$0xff] %vm71_vm1, %v2028_v40 }
 0x384   :  { %v1447_v41 = vpop.f32.mrf.mxu1 }
 0x385   :  { %1526 = vst.msk [vmem:[%s2672_s4 + $0xa0] sm:$0xff] %vm71_vm1, %v1447_v41 }
 0x386   :  { %v2031_v42 = vpop.f32.mrf.mxu1 }
 0x387   :  { %1529 = vst.msk [vmem:[%s2672_s4 + $0xb8] sm:$0xff] %vm71_vm1, %v2031_v42 }
 0x388   :  { %v1457_v43 = vpop.f32.mrf.mxu1 }
 0x389   :  { %1528 = vst.msk [vmem:[%s2672_s4 + $0xb0] sm:$0xff] %vm71_vm1, %v1457_v43 }
 0x38a   :  { %v2034_v60 = vpop.f32.mrf.mxu1 }
 0x38b   :  { %1531 = vst.msk [vmem:[%s2672_s4 + $0xc8] sm:$0xff] %vm71_vm1, %v2034_v60 }
 0x38c   :  { %v1467_v44 = vpop.f32.mrf.mxu1 }
 0x38d   :  { %1530 = vst.msk [vmem:[%s2672_s4 + $0xc0] sm:$0xff] %vm71_vm1, %v1467_v44 }
 0x38e   :  { %v2037_v45 = vpop.f32.mrf.mxu1 }
 0x38f   :  { %1533 = vst.msk [vmem:[%s2672_s4 + $0xd8] sm:$0xff] %vm71_vm1, %v2037_v45 }
 0x390   :  { %v1477_v46 = vpop.f32.mrf.mxu1 }
 0x391   :  { %1532 = vst.msk [vmem:[%s2672_s4 + $0xd0] sm:$0xff] %vm71_vm1, %v1477_v46 }
 0x392   :  { %v2040_v47 = vpop.f32.mrf.mxu1 }
 0x393   :  { %1535 = vst.msk [vmem:[%s2672_s4 + $0xe8] sm:$0xff] %vm71_vm1, %v2040_v47 }
 0x394   :  { %v1487_v48 = vpop.f32.mrf.mxu1 }
 0x395   :  { %1534 = vst.msk [vmem:[%s2672_s4 + $0xe0] sm:$0xff] %vm71_vm1, %v1487_v48 }
 0x396   :  { %v2043_v49 = vpop.f32.mrf.mxu1 }
 0x397   :  { %1537 = vst.msk [vmem:[%s2672_s4 + $0xf8] sm:$0xff] %vm71_vm1, %v2043_v49 }
 0x398   :  { %v1497_v50 = vpop.f32.mrf.mxu1 }
 0x399   :  { %1536 = vst.msk [vmem:[%s2672_s4 + $0xf0] sm:$0xff] %vm71_vm1, %v1497_v50 }
 0x39a   :  { %1542 = vsyncpa [#allocation3], 1 }

</bundles_post_ra>
